<compile_context>
chip_gen: v5e
topology: v5e:2x2
jax: 0.10.0
libtpu: 0.0.40
codegen_flags: <defaults>
</compile_context>

<pallas_src>
import functools
import math

import jax
import jax.numpy as jnp
from jax import lax
from jax.experimental import pallas as pl
from jax.experimental.pallas import tpu as pltpu


def _round_up(x, m):
    return ((x + m - 1) // m) * m


def _packing_gru_kernel(len_ref, x_ref, wi_ref, wh_ref, bi_ref, bh_ref,
                        out_ref, gi_ref, h_ref, *, unroll):
    """One (batch-block, time-block) grid step: batched input projection + recurrence."""
    T_blk, B_blk, Ip = x_ref.shape
    _, Hp = h_ref.shape
    G = 3 * Hp
    tb = pl.program_id(1)

    # ---- Phase 1: input projection for the whole time block in one bf16 MXU matmul
    # (f32 accumulate), stored as bf16 scratch; b_ih is folded in later in f32.
    x2d = x_ref[...].reshape(T_blk * B_blk, Ip)           # B_blk is 8-aligned: free reshape
    gi = jnp.dot(x2d, wi_ref[...], preferred_element_type=jnp.float32)
    gi_ref[...] = gi.reshape(T_blk, B_blk, G).astype(gi_ref.dtype)

    # New batch block starts at time-block 0: reset the persistent hidden-state carry.
    @pl.when(tb == 0)
    def _():
        h_ref[...] = jnp.zeros_like(h_ref)

    # Loop-invariant values hoisted out of the serial recurrence.
    wh = wh_ref[...]                                      # (Hp, 3Hp) bf16, stationary
    bi = jnp.broadcast_to(bi_ref[...], (B_blk, G))
    bh = jnp.broadcast_to(bh_ref[...], (B_blk, G))
    lens = len_ref[...]                                   # (B_blk, 1) int32
    t0 = tb * T_blk

    # ---- Phase 2: serial time recurrence; h is the register-resident loop carry.
    def step(t, h):
        gi_t = gi_ref[t].astype(jnp.float32) + bi         # (B_blk, 3Hp) f32
        gh = jnp.dot(h.astype(jnp.bfloat16), wh,
                     preferred_element_type=jnp.float32) + bh
        # Gate slices are 128-lane aligned (Hp multiple of 128); math in f32.
        r = jax.nn.sigmoid(gi_t[:, :Hp] + gh[:, :Hp])
        z = jax.nn.sigmoid(gi_t[:, Hp:2 * Hp] + gh[:, Hp:2 * Hp])
        n = jnp.tanh(gi_t[:, 2 * Hp:] + r * gh[:, 2 * Hp:])
        h_new = (1.0 - z) * n + z * h

        # Packing semantics: freeze h on padded steps; padded outputs are zero.
        valid = (t0 + t) < lens                           # (B_blk, 1) bool
        out_ref[t] = jnp.where(valid, h_new, 0.0).astype(out_ref.dtype)
        return jnp.where(valid, h_new, h)

    h_ref[...] = lax.fori_loop(0, T_blk, step, h_ref[...], unroll=unroll)


def packing_gru_pallas(inputs, mask, w_ih, w_hh, b_ih, b_hh,
                       *, time_block=32, batch_block=None):
    """inputs: (B, T, I) f32, mask: (B, T) {0,1} contiguous-from-t=0.

    Returns (B, L_max, H) f32. Set batch_block=8 on v7x to shard sequences across
    both TensorCores ("parallel" leading grid axis).
    """
    B, T, I = inputs.shape
    H = w_hh.shape[1]

    Hp = _round_up(max(H, 128), 128)      # lane-aligned per-gate width
    Ip = _round_up(max(I, 128), 128)      # aligned contraction dim
    G = 3 * Hp

    Bp = _round_up(max(B, 8), 8)          # sublane-dense batch
    if batch_block is None:
        B_blk = Bp                        # single batch block: best latency on 1-TC chips
    else:
        B_blk = _round_up(min(batch_block, Bp), 8)
    Bp = _round_up(Bp, B_blk)
    nb = Bp // B_blk

    T_blk = max(1, min(time_block, T))    # default 32 -> >=256 matmul rows at B_blk=8
    Tp = _round_up(T, T_blk)
    nt = Tp // T_blk

    # ---- Host-side layout: time-major x, lengths vector, gate-separated weights.
    x_tm = jnp.transpose(inputs.astype(jnp.float32), (1, 0, 2))          # (T, B, I)
    x_p = jnp.pad(x_tm, ((0, Tp - T), (0, Bp - B), (0, Ip - I))).astype(jnp.bfloat16)

    lengths = jnp.sum(mask.astype(jnp.int32), axis=1)                    # (B,)
    len_p = jnp.pad(lengths, (0, Bp - B)).reshape(Bp, 1).astype(jnp.int32)

    # Gate-separated, lane-aligned weight layout: gate g occupies lanes
    # [g*Hp, (g+1)*Hp) so gate slicing never cuts inside a 128-lane vreg.
    def gate_pack(w, rows, rows_p):
        gates = []
        for g in range(3):
            wg = jnp.transpose(w[g * H:(g + 1) * H, :], (1, 0))          # (rows, H)
            gates.append(jnp.pad(wg, ((0, rows_p - rows), (0, Hp - H))))
        return jnp.concatenate(gates, axis=1)                            # (rows_p, 3Hp)

    wi_p = gate_pack(w_ih.astype(jnp.float32), I, Ip).astype(jnp.bfloat16)   # (Ip, 3Hp)
    wh_p = gate_pack(w_hh.astype(jnp.float32), H, Hp).astype(jnp.bfloat16)   # (Hp, 3Hp)

    def bias_pack(b):
        return jnp.concatenate(
            [jnp.pad(b[g * H:(g + 1) * H].astype(jnp.float32), (0, Hp - H))
             for g in range(3)])[None, :]                                    # (1, 3Hp)

    bi_p = bias_pack(b_ih)
    bh_p = bias_pack(b_hh)

    unroll = T_blk if T_blk <= 8 else 4
    kernel = functools.partial(_packing_gru_kernel, unroll=unroll)

    # Size the scoped VMEM limit from the actual resident set (double-buffered
    # x/out blocks + weights + scratches), with 2x headroom.
    def nbytes(shape, itemsize):
        return math.prod(shape) * itemsize
    resident = (
        2 * nbytes((T_blk, B_blk, Ip), 2)            # x blocks (bf16, double-buffered)
        + 2 * nbytes((T_blk, B_blk, Hp), 4)          # out blocks (f32, double-buffered)
        + 2 * (nbytes((Ip, G), 2) + nbytes((Hp, G), 2))   # weights
        + 6 * nbytes((8, 128), 4)                    # biases / lengths (tile-padded)
        + nbytes((T_blk, B_blk, G), 2)               # gi scratch (bf16)
        + nbytes((B_blk, Hp), 4)                     # h scratch
    )
    vmem_limit = int(min(120 * 1024 * 1024, max(32 * 1024 * 1024, 2 * resident)))

    out_p = pl.pallas_call(
        kernel,
        out_shape=jax.ShapeDtypeStruct((Tp, Bp, Hp), jnp.float32),
        grid_spec=pltpu.PrefetchScalarGridSpec(
            num_scalar_prefetch=0,
            grid=(nb, nt),
            in_specs=[
                pl.BlockSpec((B_blk, 1), lambda bb, tb: (bb, 0)),            # lengths
                pl.BlockSpec((T_blk, B_blk, Ip), lambda bb, tb: (tb, bb, 0)),  # x block
                pl.BlockSpec((Ip, G), lambda bb, tb: (0, 0)),                # W_ih^T
                pl.BlockSpec((Hp, G), lambda bb, tb: (0, 0)),                # W_hh^T
                pl.BlockSpec((1, G), lambda bb, tb: (0, 0)),                 # b_ih
                pl.BlockSpec((1, G), lambda bb, tb: (0, 0)),                 # b_hh
            ],
            out_specs=pl.BlockSpec((T_blk, B_blk, Hp), lambda bb, tb: (tb, bb, 0)),
            scratch_shapes=[
                pltpu.VMEM((T_blk, B_blk, G), jnp.bfloat16),   # per-block input proj
                pltpu.VMEM((B_blk, Hp), jnp.float32),          # persistent hidden state
            ],
        ),
        compiler_params=pltpu.CompilerParams(
            dimension_semantics=("parallel", "arbitrary"),
            vmem_limit_bytes=vmem_limit,
        ),
    )(len_p, x_p, wi_p, wh_p, bi_p, bh_p)

    out = out_p.transpose(1, 0, 2)[:B, :T, :H]                              # (B, T, H)

    # pad_packed_sequence pads only up to the longest valid length.
    # NOTE: int() forces a host sync; pass a static max length instead if this
    # wrapper must run under jax.jit with traced masks.
    L_max = int(jnp.max(lengths))
    return out[:, :L_max, :]


def packing_gru_reference(inputs, mask, w_ih, w_hh, b_ih, b_hh):
    """Pure-JAX f32 reference matching PyTorch GRU + pack/pad semantics."""
    B, T, I = inputs.shape
    H = w_hh.shape[1]
    h = jnp.zeros((B, H), jnp.float32)
    outs = []
    for t in range(T):
        x = inputs[:, t, :].astype(jnp.float32)
        m = mask[:, t].astype(jnp.float32)[:, None]
        gi = x @ w_ih.T + b_ih
        gh = h @ w_hh.T + b_hh
        r = jax.nn.sigmoid(gi[:, :H] + gh[:, :H])
        z = jax.nn.sigmoid(gi[:, H:2 * H] + gh[:, H:2 * H])
        n = jnp.tanh(gi[:, 2 * H:] + r * gh[:, 2 * H:])
        h_new = (1.0 - z) * n + z * h
        h = m * h_new + (1.0 - m) * h
        outs.append(m * h_new)
    out = jnp.stack(outs, axis=1)
    L_max = int(jnp.max(jnp.sum(mask, axis=1)))
    return out[:, :L_max, :]


if __name__ == "__main__":
    # Small shapes consistent with an (input_size=16, hidden_size=32) GRU.
    B, T, I, H = 4, 8, 16, 32

    key = jax.random.PRNGKey(0)
    k_x, k_wi, k_wh, k_bi, k_bh = jax.random.split(key, 5)

    inputs = jax.random.normal(k_x, (B, T, I), dtype=jnp.float32)

    # Contiguous-valid mask (true lengths), as required by pack_padded_sequence.
    lengths = jnp.array([8, 5, 3, 6], dtype=jnp.int32)          # one full-length seq
    mask = (jnp.arange(T)[None, :] < lengths[:, None]).astype(jnp.float32)   # (B, T)

    # Deterministic PyTorch-style GRU parameter init: U(-1/sqrt(H), 1/sqrt(H)).
    bound = 1.0 / (H ** 0.5)
    w_ih = jax.random.uniform(k_wi, (3 * H, I), minval=-bound, maxval=bound)
    w_hh = jax.random.uniform(k_wh, (3 * H, H), minval=-bound, maxval=bound)
    b_ih = jax.random.uniform(k_bi, (3 * H,), minval=-bound, maxval=bound)
    b_hh = jax.random.uniform(k_bh, (3 * H,), minval=-bound, maxval=bound)

    out = packing_gru_pallas(inputs, mask, w_ih, w_hh, b_ih, b_hh)
    out = jax.block_until_ready(out)

    ref = packing_gru_reference(inputs, mask, w_ih, w_hh, b_ih, b_hh)
    assert out.shape == ref.shape, (out.shape, ref.shape)
    # bf16 MXU operands / bf16 gi scratch (f32 accumulate & gate math) => looser
    # tolerance vs the f32 reference.
    max_err = float(jnp.abs(out - ref).max())
    assert jnp.allclose(out, ref, atol=2e-2, rtol=2e-2), max_err

    print("KERNEL_OK")
</pallas_src>

<mosaic_0001>
module attributes {stable_mosaic.version = 11 : i64} {
  func.func @_packing_gru_kernel(%arg0: i32, %arg1: i32, %arg2: memref<8x1xi32, #tpu.memory_space<vmem>>, %arg3: memref<8x8x128xbf16, #tpu.memory_space<vmem>>, %arg4: memref<128x384xbf16, #tpu.memory_space<vmem>>, %arg5: memref<128x384xbf16, #tpu.memory_space<vmem>>, %arg6: memref<1x384xf32, #tpu.memory_space<vmem>>, %arg7: memref<1x384xf32, #tpu.memory_space<vmem>>, %arg8: memref<8x8x128xf32, #tpu.memory_space<vmem>>, %arg9: memref<8x8x384xbf16, #tpu.memory_space<vmem>>, %arg10: memref<8x128xf32, #tpu.memory_space<vmem>>) attributes {dimension_semantics = [#tpu.dimension_semantics<parallel>, #tpu.dimension_semantics<arbitrary>], iteration_bounds = array<i64: 1, 1>, scalar_prefetch = 0 : i64, scratch_operands = 2 : i64, tpu.core_type = #tpu.core_type<tc>, window_params = [{transform_indices = @transform_0, window_bounds = array<i64: 8, 1>}, {transform_indices = @transform_1, window_bounds = array<i64: 8, 8, 128>}, {pipeline_mode = #tpu.pipeline_mode<synchronous>, transform_indices = @transform_2, window_bounds = array<i64: 128, 384>}, {pipeline_mode = #tpu.pipeline_mode<synchronous>, transform_indices = @transform_3, window_bounds = array<i64: 128, 384>}, {pipeline_mode = #tpu.pipeline_mode<synchronous>, transform_indices = @transform_4, window_bounds = array<i64: 1, 384>}, {pipeline_mode = #tpu.pipeline_mode<synchronous>, transform_indices = @transform_5, window_bounds = array<i64: 1, 384>}, {transform_indices = @transform_6, window_bounds = array<i64: 8, 8, 128>}]} {
    %c0 = arith.constant 0 : index
    %c0_0 = arith.constant 0 : index
    %c0_1 = arith.constant 0 : index
    %0 = vector.load %arg3[%c0, %c0_0, %c0_1] : memref<8x8x128xbf16, #tpu.memory_space<vmem>>, vector<8x8x128xbf16>
    %1 = vector.shape_cast %0 : vector<8x8x128xbf16> to vector<64x128xbf16>
    %c0_2 = arith.constant 0 : index
    %c0_3 = arith.constant 0 : index
    %2 = vector.load %arg4[%c0_2, %c0_3] : memref<128x384xbf16, #tpu.memory_space<vmem>>, vector<128x384xbf16>
    %cst = arith.constant dense<0.000000e+00> : vector<64x384xf32>
    %3 = tpu.matmul %1, %2, %cst {dimension_numbers = #tpu.dot_dimension_numbers<[1], [0], [0], [1], [0, 0, 1, 1], [], []>} : vector<64x128xbf16>, vector<128x384xbf16>, vector<64x384xf32> -> vector<64x384xf32>
    %4 = vector.shape_cast %3 : vector<64x384xf32> to vector<8x8x384xf32>
    %5 = arith.truncf %4 : vector<8x8x384xf32> to vector<8x8x384xbf16>
    %c0_4 = arith.constant 0 : index
    %c0_5 = arith.constant 0 : index
    %c0_6 = arith.constant 0 : index
    %6 = vector.load %arg9[%c0_4, %c0_5, %c0_6] : memref<8x8x384xbf16, #tpu.memory_space<vmem>>, vector<8x8x384xbf16>
    tpu.vector_store %arg9[%c0_4, %c0_5, %c0_6], %5 {strides = array<i32>} : memref<8x8x384xbf16, #tpu.memory_space<vmem>>, vector<8x8x384xbf16>,
    %c0_i32 = arith.constant 0 : i32
    %7 = arith.cmpi eq, %arg1, %c0_i32 : i32
    %8 = arith.extui %7 : i1 to i32
    %c0_i32_7 = arith.constant 0 : i32
    %9 = arith.cmpi ne, %8, %c0_i32_7 : i32
    scf.if %9 {
      %cst_94 = arith.constant 0.000000e+00 : f32
      %405 = vector.broadcast %cst_94 : f32 to vector<8x128xf32>
      %c0_95 = arith.constant 0 : index
      %c0_96 = arith.constant 0 : index
      %406 = vector.load %arg10[%c0_95, %c0_96] : memref<8x128xf32, #tpu.memory_space<vmem>>, vector<8x128xf32>
      tpu.vector_store %arg10[%c0_95, %c0_96], %405 {strides = array<i32>} : memref<8x128xf32, #tpu.memory_space<vmem>>, vector<8x128xf32>,
    } else {
    }
    %c0_8 = arith.constant 0 : index
    %c0_9 = arith.constant 0 : index
    %10 = vector.load %arg5[%c0_8, %c0_9] : memref<128x384xbf16, #tpu.memory_space<vmem>>, vector<128x384xbf16>
    %c0_10 = arith.constant 0 : index
    %c0_11 = arith.constant 0 : index
    %11 = vector.load %arg6[%c0_10, %c0_11] : memref<1x384xf32, #tpu.memory_space<vmem>>, vector<1x384xf32>
    %12 = vector.shape_cast %11 : vector<1x384xf32> to vector<1x384xf32>
    %13 = vector.broadcast %12 : vector<1x384xf32> to vector<8x384xf32>
    %c0_12 = arith.constant 0 : index
    %c0_13 = arith.constant 0 : index
    %14 = vector.load %arg7[%c0_12, %c0_13] : memref<1x384xf32, #tpu.memory_space<vmem>>, vector<1x384xf32>
    %15 = vector.shape_cast %14 : vector<1x384xf32> to vector<1x384xf32>
    %16 = vector.broadcast %15 : vector<1x384xf32> to vector<8x384xf32>
    %c0_14 = arith.constant 0 : index
    %c0_15 = arith.constant 0 : index
    %17 = vector.load %arg2[%c0_14, %c0_15] : memref<8x1xi32, #tpu.memory_space<vmem>>, vector<8x1xi32>
    %c8_i32 = arith.constant 8 : i32
    %18 = arith.muli %arg1, %c8_i32 : i32
    %c0_16 = arith.constant 0 : index
    %c0_17 = arith.constant 0 : index
    %19 = vector.load %arg10[%c0_16, %c0_17] : memref<8x128xf32, #tpu.memory_space<vmem>>, vector<8x128xf32>
    %c0_i32_18 = arith.constant 0 : i32
    %20 = arith.index_cast %c0_i32_18 : i32 to index
    %c0_19 = arith.constant 0 : index
    %c0_20 = arith.constant 0 : index
    %21 = vector.load %arg9[%20, %c0_19, %c0_20] : memref<8x8x384xbf16, #tpu.memory_space<vmem>>, vector<1x8x384xbf16>
    %22 = vector.shape_cast %21 : vector<1x8x384xbf16> to vector<8x384xbf16>
    %23 = arith.extf %22 : vector<8x384xbf16> to vector<8x384xf32>
    %24 = arith.addf %23, %13 : vector<8x384xf32>
    %25 = arith.truncf %19 : vector<8x128xf32> to vector<8x128xbf16>
    %cst_21 = arith.constant dense<0.000000e+00> : vector<8x384xf32>
    %26 = tpu.matmul %25, %10, %cst_21 {dimension_numbers = #tpu.dot_dimension_numbers<[1], [0], [0], [1], [0, 0, 1, 1], [], []>} : vector<8x128xbf16>, vector<128x384xbf16>, vector<8x384xf32> -> vector<8x384xf32>
    %27 = arith.addf %26, %16 : vector<8x384xf32>
    %28 = vector.extract_strided_slice %24 {offsets = [0, 0], sizes = [8, 128], strides = [1, 1]} : vector<8x384xf32> to vector<8x128xf32>
    %29 = vector.extract_strided_slice %27 {offsets = [0, 0], sizes = [8, 128], strides = [1, 1]} : vector<8x384xf32> to vector<8x128xf32>
    %30 = arith.addf %28, %29 : vector<8x128xf32>
    %31 = arith.negf %30 : vector<8x128xf32>
    %32 = math.exp %31 : vector<8x128xf32>
    %cst_22 = arith.constant 1.000000e+00 : f32
    %33 = vector.broadcast %cst_22 : f32 to vector<8x128xf32>
    %34 = arith.addf %33, %32 : vector<8x128xf32>
    %35 = arith.divf %33, %34 : vector<8x128xf32>
    %36 = vector.extract_strided_slice %24 {offsets = [0, 128], sizes = [8, 128], strides = [1, 1]} : vector<8x384xf32> to vector<8x128xf32>
    %37 = vector.extract_strided_slice %27 {offsets = [0, 128], sizes = [8, 128], strides = [1, 1]} : vector<8x384xf32> to vector<8x128xf32>
    %38 = arith.addf %36, %37 : vector<8x128xf32>
    %39 = arith.negf %38 : vector<8x128xf32>
    %40 = math.exp %39 : vector<8x128xf32>
    %cst_23 = arith.constant 1.000000e+00 : f32
    %41 = vector.broadcast %cst_23 : f32 to vector<8x128xf32>
    %42 = arith.addf %41, %40 : vector<8x128xf32>
    %43 = arith.divf %41, %42 : vector<8x128xf32>
    %44 = vector.extract_strided_slice %24 {offsets = [0, 256], sizes = [8, 128], strides = [1, 1]} : vector<8x384xf32> to vector<8x128xf32>
    %45 = vector.extract_strided_slice %27 {offsets = [0, 256], sizes = [8, 128], strides = [1, 1]} : vector<8x384xf32> to vector<8x128xf32>
    %46 = arith.mulf %35, %45 : vector<8x128xf32>
    %47 = arith.addf %44, %46 : vector<8x128xf32>
    %48 = math.tanh %47 : vector<8x128xf32>
    %cst_24 = arith.constant 1.000000e+00 : f32
    %49 = vector.broadcast %cst_24 : f32 to vector<8x128xf32>
    %50 = arith.subf %49, %43 : vector<8x128xf32>
    %51 = arith.mulf %50, %48 : vector<8x128xf32>
    %52 = arith.mulf %43, %19 : vector<8x128xf32>
    %53 = arith.addf %51, %52 : vector<8x128xf32>
    %54 = arith.addi %18, %c0_i32_18 : i32
    %55 = vector.broadcast %54 : i32 to vector<8x1xi32>
    %56 = arith.cmpi slt, %55, %17 : vector<8x1xi32>
    %cst_25 = arith.constant 0.000000e+00 : f32
    %57 = vector.shape_cast %56 : vector<8x1xi1> to vector<8x1xi1>
    %58 = vector.broadcast %57 : vector<8x1xi1> to vector<8x128xi1>
    %59 = vector.broadcast %cst_25 : f32 to vector<8x128xf32>
    %60 = arith.select %58, %53, %59 : vector<8x128xi1>, vector<8x128xf32>
    %61 = arith.index_cast %c0_i32_18 : i32 to index
    %c0_26 = arith.constant 0 : index
    %c0_27 = arith.constant 0 : index
    %62 = vector.load %arg8[%61, %c0_26, %c0_27] : memref<8x8x128xf32, #tpu.memory_space<vmem>>, vector<1x8x128xf32>
    %63 = vector.shape_cast %62 : vector<1x8x128xf32> to vector<8x128xf32>
    %64 = vector.shape_cast %60 : vector<8x128xf32> to vector<1x8x128xf32>
    tpu.vector_store %arg8[%61, %c0_26, %c0_27], %64 {strides = array<i32>} : memref<8x8x128xf32, #tpu.memory_space<vmem>>, vector<1x8x128xf32>,
    %65 = vector.shape_cast %56 : vector<8x1xi1> to vector<8x1xi1>
    %66 = vector.broadcast %65 : vector<8x1xi1> to vector<8x128xi1>
    %67 = arith.select %66, %53, %19 : vector<8x128xi1>, vector<8x128xf32>
    %c1_i32 = arith.constant 1 : i32
    %68 = arith.index_cast %c1_i32 : i32 to index
    %c0_28 = arith.constant 0 : index
    %c0_29 = arith.constant 0 : index
    %69 = vector.load %arg9[%68, %c0_28, %c0_29] : memref<8x8x384xbf16, #tpu.memory_space<vmem>>, vector<1x8x384xbf16>
    %70 = vector.shape_cast %69 : vector<1x8x384xbf16> to vector<8x384xbf16>
    %71 = arith.extf %70 : vector<8x384xbf16> to vector<8x384xf32>
    %72 = arith.addf %71, %13 : vector<8x384xf32>
    %73 = arith.truncf %67 : vector<8x128xf32> to vector<8x128xbf16>
    %cst_30 = arith.constant dense<0.000000e+00> : vector<8x384xf32>
    %74 = tpu.matmul %73, %10, %cst_30 {dimension_numbers = #tpu.dot_dimension_numbers<[1], [0], [0], [1], [0, 0, 1, 1], [], []>} : vector<8x128xbf16>, vector<128x384xbf16>, vector<8x384xf32> -> vector<8x384xf32>
    %75 = arith.addf %74, %16 : vector<8x384xf32>
    %76 = vector.extract_strided_slice %72 {offsets = [0, 0], sizes = [8, 128], strides = [1, 1]} : vector<8x384xf32> to vector<8x128xf32>
    %77 = vector.extract_strided_slice %75 {offsets = [0, 0], sizes = [8, 128], strides = [1, 1]} : vector<8x384xf32> to vector<8x128xf32>
    %78 = arith.addf %76, %77 : vector<8x128xf32>
    %79 = arith.negf %78 : vector<8x128xf32>
    %80 = math.exp %79 : vector<8x128xf32>
    %cst_31 = arith.constant 1.000000e+00 : f32
    %81 = vector.broadcast %cst_31 : f32 to vector<8x128xf32>
    %82 = arith.addf %81, %80 : vector<8x128xf32>
    %83 = arith.divf %81, %82 : vector<8x128xf32>
    %84 = vector.extract_strided_slice %72 {offsets = [0, 128], sizes = [8, 128], strides = [1, 1]} : vector<8x384xf32> to vector<8x128xf32>
    %85 = vector.extract_strided_slice %75 {offsets = [0, 128], sizes = [8, 128], strides = [1, 1]} : vector<8x384xf32> to vector<8x128xf32>
    %86 = arith.addf %84, %85 : vector<8x128xf32>
    %87 = arith.negf %86 : vector<8x128xf32>
    %88 = math.exp %87 : vector<8x128xf32>
    %cst_32 = arith.constant 1.000000e+00 : f32
    %89 = vector.broadcast %cst_32 : f32 to vector<8x128xf32>
    %90 = arith.addf %89, %88 : vector<8x128xf32>
    %91 = arith.divf %89, %90 : vector<8x128xf32>
    %92 = vector.extract_strided_slice %72 {offsets = [0, 256], sizes = [8, 128], strides = [1, 1]} : vector<8x384xf32> to vector<8x128xf32>
    %93 = vector.extract_strided_slice %75 {offsets = [0, 256], sizes = [8, 128], strides = [1, 1]} : vector<8x384xf32> to vector<8x128xf32>
    %94 = arith.mulf %83, %93 : vector<8x128xf32>
    %95 = arith.addf %92, %94 : vector<8x128xf32>
    %96 = math.tanh %95 : vector<8x128xf32>
    %cst_33 = arith.constant 1.000000e+00 : f32
    %97 = vector.broadcast %cst_33 : f32 to vector<8x128xf32>
    %98 = arith.subf %97, %91 : vector<8x128xf32>
    %99 = arith.mulf %98, %96 : vector<8x128xf32>
    %100 = arith.mulf %91, %67 : vector<8x128xf32>
    %101 = arith.addf %99, %100 : vector<8x128xf32>
    %102 = arith.addi %18, %c1_i32 : i32
    %103 = vector.broadcast %102 : i32 to vector<8x1xi32>
    %104 = arith.cmpi slt, %103, %17 : vector<8x1xi32>
    %cst_34 = arith.constant 0.000000e+00 : f32
    %105 = vector.shape_cast %104 : vector<8x1xi1> to vector<8x1xi1>
    %106 = vector.broadcast %105 : vector<8x1xi1> to vector<8x128xi1>
    %107 = vector.broadcast %cst_34 : f32 to vector<8x128xf32>
    %108 = arith.select %106, %101, %107 : vector<8x128xi1>, vector<8x128xf32>
    %109 = arith.index_cast %c1_i32 : i32 to index
    %c0_35 = arith.constant 0 : index
    %c0_36 = arith.constant 0 : index
    %110 = vector.load %arg8[%109, %c0_35, %c0_36] : memref<8x8x128xf32, #tpu.memory_space<vmem>>, vector<1x8x128xf32>
    %111 = vector.shape_cast %110 : vector<1x8x128xf32> to vector<8x128xf32>
    %112 = vector.shape_cast %108 : vector<8x128xf32> to vector<1x8x128xf32>
    tpu.vector_store %arg8[%109, %c0_35, %c0_36], %112 {strides = array<i32>} : memref<8x8x128xf32, #tpu.memory_space<vmem>>, vector<1x8x128xf32>,
    %113 = vector.shape_cast %104 : vector<8x1xi1> to vector<8x1xi1>
    %114 = vector.broadcast %113 : vector<8x1xi1> to vector<8x128xi1>
    %115 = arith.select %114, %101, %67 : vector<8x128xi1>, vector<8x128xf32>
    %c2_i32 = arith.constant 2 : i32
    %116 = arith.index_cast %c2_i32 : i32 to index
    %c0_37 = arith.constant 0 : index
    %c0_38 = arith.constant 0 : index
    %117 = vector.load %arg9[%116, %c0_37, %c0_38] : memref<8x8x384xbf16, #tpu.memory_space<vmem>>, vector<1x8x384xbf16>
    %118 = vector.shape_cast %117 : vector<1x8x384xbf16> to vector<8x384xbf16>
    %119 = arith.extf %118 : vector<8x384xbf16> to vector<8x384xf32>
    %120 = arith.addf %119, %13 : vector<8x384xf32>
    %121 = arith.truncf %115 : vector<8x128xf32> to vector<8x128xbf16>
    %cst_39 = arith.constant dense<0.000000e+00> : vector<8x384xf32>
    %122 = tpu.matmul %121, %10, %cst_39 {dimension_numbers = #tpu.dot_dimension_numbers<[1], [0], [0], [1], [0, 0, 1, 1], [], []>} : vector<8x128xbf16>, vector<128x384xbf16>, vector<8x384xf32> -> vector<8x384xf32>
    %123 = arith.addf %122, %16 : vector<8x384xf32>
    %124 = vector.extract_strided_slice %120 {offsets = [0, 0], sizes = [8, 128], strides = [1, 1]} : vector<8x384xf32> to vector<8x128xf32>
    %125 = vector.extract_strided_slice %123 {offsets = [0, 0], sizes = [8, 128], strides = [1, 1]} : vector<8x384xf32> to vector<8x128xf32>
    %126 = arith.addf %124, %125 : vector<8x128xf32>
    %127 = arith.negf %126 : vector<8x128xf32>
    %128 = math.exp %127 : vector<8x128xf32>
    %cst_40 = arith.constant 1.000000e+00 : f32
    %129 = vector.broadcast %cst_40 : f32 to vector<8x128xf32>
    %130 = arith.addf %129, %128 : vector<8x128xf32>
    %131 = arith.divf %129, %130 : vector<8x128xf32>
    %132 = vector.extract_strided_slice %120 {offsets = [0, 128], sizes = [8, 128], strides = [1, 1]} : vector<8x384xf32> to vector<8x128xf32>
    %133 = vector.extract_strided_slice %123 {offsets = [0, 128], sizes = [8, 128], strides = [1, 1]} : vector<8x384xf32> to vector<8x128xf32>
    %134 = arith.addf %132, %133 : vector<8x128xf32>
    %135 = arith.negf %134 : vector<8x128xf32>
    %136 = math.exp %135 : vector<8x128xf32>
    %cst_41 = arith.constant 1.000000e+00 : f32
    %137 = vector.broadcast %cst_41 : f32 to vector<8x128xf32>
    %138 = arith.addf %137, %136 : vector<8x128xf32>
    %139 = arith.divf %137, %138 : vector<8x128xf32>
    %140 = vector.extract_strided_slice %120 {offsets = [0, 256], sizes = [8, 128], strides = [1, 1]} : vector<8x384xf32> to vector<8x128xf32>
    %141 = vector.extract_strided_slice %123 {offsets = [0, 256], sizes = [8, 128], strides = [1, 1]} : vector<8x384xf32> to vector<8x128xf32>
    %142 = arith.mulf %131, %141 : vector<8x128xf32>
    %143 = arith.addf %140, %142 : vector<8x128xf32>
    %144 = math.tanh %143 : vector<8x128xf32>
    %cst_42 = arith.constant 1.000000e+00 : f32
    %145 = vector.broadcast %cst_42 : f32 to vector<8x128xf32>
    %146 = arith.subf %145, %139 : vector<8x128xf32>
    %147 = arith.mulf %146, %144 : vector<8x128xf32>
    %148 = arith.mulf %139, %115 : vector<8x128xf32>
    %149 = arith.addf %147, %148 : vector<8x128xf32>
    %150 = arith.addi %18, %c2_i32 : i32
    %151 = vector.broadcast %150 : i32 to vector<8x1xi32>
    %152 = arith.cmpi slt, %151, %17 : vector<8x1xi32>
    %cst_43 = arith.constant 0.000000e+00 : f32
    %153 = vector.shape_cast %152 : vector<8x1xi1> to vector<8x1xi1>
    %154 = vector.broadcast %153 : vector<8x1xi1> to vector<8x128xi1>
    %155 = vector.broadcast %cst_43 : f32 to vector<8x128xf32>
    %156 = arith.select %154, %149, %155 : vector<8x128xi1>, vector<8x128xf32>
    %157 = arith.index_cast %c2_i32 : i32 to index
    %c0_44 = arith.constant 0 : index
    %c0_45 = arith.constant 0 : index
    %158 = vector.load %arg8[%157, %c0_44, %c0_45] : memref<8x8x128xf32, #tpu.memory_space<vmem>>, vector<1x8x128xf32>
    %159 = vector.shape_cast %158 : vector<1x8x128xf32> to vector<8x128xf32>
    %160 = vector.shape_cast %156 : vector<8x128xf32> to vector<1x8x128xf32>
    tpu.vector_store %arg8[%157, %c0_44, %c0_45], %160 {strides = array<i32>} : memref<8x8x128xf32, #tpu.memory_space<vmem>>, vector<1x8x128xf32>,
    %161 = vector.shape_cast %152 : vector<8x1xi1> to vector<8x1xi1>
    %162 = vector.broadcast %161 : vector<8x1xi1> to vector<8x128xi1>
    %163 = arith.select %162, %149, %115 : vector<8x128xi1>, vector<8x128xf32>
    %c3_i32 = arith.constant 3 : i32
    %164 = arith.index_cast %c3_i32 : i32 to index
    %c0_46 = arith.constant 0 : index
    %c0_47 = arith.constant 0 : index
    %165 = vector.load %arg9[%164, %c0_46, %c0_47] : memref<8x8x384xbf16, #tpu.memory_space<vmem>>, vector<1x8x384xbf16>
    %166 = vector.shape_cast %165 : vector<1x8x384xbf16> to vector<8x384xbf16>
    %167 = arith.extf %166 : vector<8x384xbf16> to vector<8x384xf32>
    %168 = arith.addf %167, %13 : vector<8x384xf32>
    %169 = arith.truncf %163 : vector<8x128xf32> to vector<8x128xbf16>
    %cst_48 = arith.constant dense<0.000000e+00> : vector<8x384xf32>
    %170 = tpu.matmul %169, %10, %cst_48 {dimension_numbers = #tpu.dot_dimension_numbers<[1], [0], [0], [1], [0, 0, 1, 1], [], []>} : vector<8x128xbf16>, vector<128x384xbf16>, vector<8x384xf32> -> vector<8x384xf32>
    %171 = arith.addf %170, %16 : vector<8x384xf32>
    %172 = vector.extract_strided_slice %168 {offsets = [0, 0], sizes = [8, 128], strides = [1, 1]} : vector<8x384xf32> to vector<8x128xf32>
    %173 = vector.extract_strided_slice %171 {offsets = [0, 0], sizes = [8, 128], strides = [1, 1]} : vector<8x384xf32> to vector<8x128xf32>
    %174 = arith.addf %172, %173 : vector<8x128xf32>
    %175 = arith.negf %174 : vector<8x128xf32>
    %176 = math.exp %175 : vector<8x128xf32>
    %cst_49 = arith.constant 1.000000e+00 : f32
    %177 = vector.broadcast %cst_49 : f32 to vector<8x128xf32>
    %178 = arith.addf %177, %176 : vector<8x128xf32>
    %179 = arith.divf %177, %178 : vector<8x128xf32>
    %180 = vector.extract_strided_slice %168 {offsets = [0, 128], sizes = [8, 128], strides = [1, 1]} : vector<8x384xf32> to vector<8x128xf32>
    %181 = vector.extract_strided_slice %171 {offsets = [0, 128], sizes = [8, 128], strides = [1, 1]} : vector<8x384xf32> to vector<8x128xf32>
    %182 = arith.addf %180, %181 : vector<8x128xf32>
    %183 = arith.negf %182 : vector<8x128xf32>
    %184 = math.exp %183 : vector<8x128xf32>
    %cst_50 = arith.constant 1.000000e+00 : f32
    %185 = vector.broadcast %cst_50 : f32 to vector<8x128xf32>
    %186 = arith.addf %185, %184 : vector<8x128xf32>
    %187 = arith.divf %185, %186 : vector<8x128xf32>
    %188 = vector.extract_strided_slice %168 {offsets = [0, 256], sizes = [8, 128], strides = [1, 1]} : vector<8x384xf32> to vector<8x128xf32>
    %189 = vector.extract_strided_slice %171 {offsets = [0, 256], sizes = [8, 128], strides = [1, 1]} : vector<8x384xf32> to vector<8x128xf32>
    %190 = arith.mulf %179, %189 : vector<8x128xf32>
    %191 = arith.addf %188, %190 : vector<8x128xf32>
    %192 = math.tanh %191 : vector<8x128xf32>
    %cst_51 = arith.constant 1.000000e+00 : f32
    %193 = vector.broadcast %cst_51 : f32 to vector<8x128xf32>
    %194 = arith.subf %193, %187 : vector<8x128xf32>
    %195 = arith.mulf %194, %192 : vector<8x128xf32>
    %196 = arith.mulf %187, %163 : vector<8x128xf32>
    %197 = arith.addf %195, %196 : vector<8x128xf32>
    %198 = arith.addi %18, %c3_i32 : i32
    %199 = vector.broadcast %198 : i32 to vector<8x1xi32>
    %200 = arith.cmpi slt, %199, %17 : vector<8x1xi32>
    %cst_52 = arith.constant 0.000000e+00 : f32
    %201 = vector.shape_cast %200 : vector<8x1xi1> to vector<8x1xi1>
    %202 = vector.broadcast %201 : vector<8x1xi1> to vector<8x128xi1>
    %203 = vector.broadcast %cst_52 : f32 to vector<8x128xf32>
    %204 = arith.select %202, %197, %203 : vector<8x128xi1>, vector<8x128xf32>
    %205 = arith.index_cast %c3_i32 : i32 to index
    %c0_53 = arith.constant 0 : index
    %c0_54 = arith.constant 0 : index
    %206 = vector.load %arg8[%205, %c0_53, %c0_54] : memref<8x8x128xf32, #tpu.memory_space<vmem>>, vector<1x8x128xf32>
    %207 = vector.shape_cast %206 : vector<1x8x128xf32> to vector<8x128xf32>
    %208 = vector.shape_cast %204 : vector<8x128xf32> to vector<1x8x128xf32>
    tpu.vector_store %arg8[%205, %c0_53, %c0_54], %208 {strides = array<i32>} : memref<8x8x128xf32, #tpu.memory_space<vmem>>, vector<1x8x128xf32>,
    %209 = vector.shape_cast %200 : vector<8x1xi1> to vector<8x1xi1>
    %210 = vector.broadcast %209 : vector<8x1xi1> to vector<8x128xi1>
    %211 = arith.select %210, %197, %163 : vector<8x128xi1>, vector<8x128xf32>
    %c4_i32 = arith.constant 4 : i32
    %212 = arith.index_cast %c4_i32 : i32 to index
    %c0_55 = arith.constant 0 : index
    %c0_56 = arith.constant 0 : index
    %213 = vector.load %arg9[%212, %c0_55, %c0_56] : memref<8x8x384xbf16, #tpu.memory_space<vmem>>, vector<1x8x384xbf16>
    %214 = vector.shape_cast %213 : vector<1x8x384xbf16> to vector<8x384xbf16>
    %215 = arith.extf %214 : vector<8x384xbf16> to vector<8x384xf32>
    %216 = arith.addf %215, %13 : vector<8x384xf32>
    %217 = arith.truncf %211 : vector<8x128xf32> to vector<8x128xbf16>
    %cst_57 = arith.constant dense<0.000000e+00> : vector<8x384xf32>
    %218 = tpu.matmul %217, %10, %cst_57 {dimension_numbers = #tpu.dot_dimension_numbers<[1], [0], [0], [1], [0, 0, 1, 1], [], []>} : vector<8x128xbf16>, vector<128x384xbf16>, vector<8x384xf32> -> vector<8x384xf32>
    %219 = arith.addf %218, %16 : vector<8x384xf32>
    %220 = vector.extract_strided_slice %216 {offsets = [0, 0], sizes = [8, 128], strides = [1, 1]} : vector<8x384xf32> to vector<8x128xf32>
    %221 = vector.extract_strided_slice %219 {offsets = [0, 0], sizes = [8, 128], strides = [1, 1]} : vector<8x384xf32> to vector<8x128xf32>
    %222 = arith.addf %220, %221 : vector<8x128xf32>
    %223 = arith.negf %222 : vector<8x128xf32>
    %224 = math.exp %223 : vector<8x128xf32>
    %cst_58 = arith.constant 1.000000e+00 : f32
    %225 = vector.broadcast %cst_58 : f32 to vector<8x128xf32>
    %226 = arith.addf %225, %224 : vector<8x128xf32>
    %227 = arith.divf %225, %226 : vector<8x128xf32>
    %228 = vector.extract_strided_slice %216 {offsets = [0, 128], sizes = [8, 128], strides = [1, 1]} : vector<8x384xf32> to vector<8x128xf32>
    %229 = vector.extract_strided_slice %219 {offsets = [0, 128], sizes = [8, 128], strides = [1, 1]} : vector<8x384xf32> to vector<8x128xf32>
    %230 = arith.addf %228, %229 : vector<8x128xf32>
    %231 = arith.negf %230 : vector<8x128xf32>
    %232 = math.exp %231 : vector<8x128xf32>
    %cst_59 = arith.constant 1.000000e+00 : f32
    %233 = vector.broadcast %cst_59 : f32 to vector<8x128xf32>
    %234 = arith.addf %233, %232 : vector<8x128xf32>
    %235 = arith.divf %233, %234 : vector<8x128xf32>
    %236 = vector.extract_strided_slice %216 {offsets = [0, 256], sizes = [8, 128], strides = [1, 1]} : vector<8x384xf32> to vector<8x128xf32>
    %237 = vector.extract_strided_slice %219 {offsets = [0, 256], sizes = [8, 128], strides = [1, 1]} : vector<8x384xf32> to vector<8x128xf32>
    %238 = arith.mulf %227, %237 : vector<8x128xf32>
    %239 = arith.addf %236, %238 : vector<8x128xf32>
    %240 = math.tanh %239 : vector<8x128xf32>
    %cst_60 = arith.constant 1.000000e+00 : f32
    %241 = vector.broadcast %cst_60 : f32 to vector<8x128xf32>
    %242 = arith.subf %241, %235 : vector<8x128xf32>
    %243 = arith.mulf %242, %240 : vector<8x128xf32>
    %244 = arith.mulf %235, %211 : vector<8x128xf32>
    %245 = arith.addf %243, %244 : vector<8x128xf32>
    %246 = arith.addi %18, %c4_i32 : i32
    %247 = vector.broadcast %246 : i32 to vector<8x1xi32>
    %248 = arith.cmpi slt, %247, %17 : vector<8x1xi32>
    %cst_61 = arith.constant 0.000000e+00 : f32
    %249 = vector.shape_cast %248 : vector<8x1xi1> to vector<8x1xi1>
    %250 = vector.broadcast %249 : vector<8x1xi1> to vector<8x128xi1>
    %251 = vector.broadcast %cst_61 : f32 to vector<8x128xf32>
    %252 = arith.select %250, %245, %251 : vector<8x128xi1>, vector<8x128xf32>
    %253 = arith.index_cast %c4_i32 : i32 to index
    %c0_62 = arith.constant 0 : index
    %c0_63 = arith.constant 0 : index
    %254 = vector.load %arg8[%253, %c0_62, %c0_63] : memref<8x8x128xf32, #tpu.memory_space<vmem>>, vector<1x8x128xf32>
    %255 = vector.shape_cast %254 : vector<1x8x128xf32> to vector<8x128xf32>
    %256 = vector.shape_cast %252 : vector<8x128xf32> to vector<1x8x128xf32>
    tpu.vector_store %arg8[%253, %c0_62, %c0_63], %256 {strides = array<i32>} : memref<8x8x128xf32, #tpu.memory_space<vmem>>, vector<1x8x128xf32>,
    %257 = vector.shape_cast %248 : vector<8x1xi1> to vector<8x1xi1>
    %258 = vector.broadcast %257 : vector<8x1xi1> to vector<8x128xi1>
    %259 = arith.select %258, %245, %211 : vector<8x128xi1>, vector<8x128xf32>
    %c5_i32 = arith.constant 5 : i32
    %260 = arith.index_cast %c5_i32 : i32 to index
    %c0_64 = arith.constant 0 : index
    %c0_65 = arith.constant 0 : index
    %261 = vector.load %arg9[%260, %c0_64, %c0_65] : memref<8x8x384xbf16, #tpu.memory_space<vmem>>, vector<1x8x384xbf16>
    %262 = vector.shape_cast %261 : vector<1x8x384xbf16> to vector<8x384xbf16>
    %263 = arith.extf %262 : vector<8x384xbf16> to vector<8x384xf32>
    %264 = arith.addf %263, %13 : vector<8x384xf32>
    %265 = arith.truncf %259 : vector<8x128xf32> to vector<8x128xbf16>
    %cst_66 = arith.constant dense<0.000000e+00> : vector<8x384xf32>
    %266 = tpu.matmul %265, %10, %cst_66 {dimension_numbers = #tpu.dot_dimension_numbers<[1], [0], [0], [1], [0, 0, 1, 1], [], []>} : vector<8x128xbf16>, vector<128x384xbf16>, vector<8x384xf32> -> vector<8x384xf32>
    %267 = arith.addf %266, %16 : vector<8x384xf32>
    %268 = vector.extract_strided_slice %264 {offsets = [0, 0], sizes = [8, 128], strides = [1, 1]} : vector<8x384xf32> to vector<8x128xf32>
    %269 = vector.extract_strided_slice %267 {offsets = [0, 0], sizes = [8, 128], strides = [1, 1]} : vector<8x384xf32> to vector<8x128xf32>
    %270 = arith.addf %268, %269 : vector<8x128xf32>
    %271 = arith.negf %270 : vector<8x128xf32>
    %272 = math.exp %271 : vector<8x128xf32>
    %cst_67 = arith.constant 1.000000e+00 : f32
    %273 = vector.broadcast %cst_67 : f32 to vector<8x128xf32>
    %274 = arith.addf %273, %272 : vector<8x128xf32>
    %275 = arith.divf %273, %274 : vector<8x128xf32>
    %276 = vector.extract_strided_slice %264 {offsets = [0, 128], sizes = [8, 128], strides = [1, 1]} : vector<8x384xf32> to vector<8x128xf32>
    %277 = vector.extract_strided_slice %267 {offsets = [0, 128], sizes = [8, 128], strides = [1, 1]} : vector<8x384xf32> to vector<8x128xf32>
    %278 = arith.addf %276, %277 : vector<8x128xf32>
    %279 = arith.negf %278 : vector<8x128xf32>
    %280 = math.exp %279 : vector<8x128xf32>
    %cst_68 = arith.constant 1.000000e+00 : f32
    %281 = vector.broadcast %cst_68 : f32 to vector<8x128xf32>
    %282 = arith.addf %281, %280 : vector<8x128xf32>
    %283 = arith.divf %281, %282 : vector<8x128xf32>
    %284 = vector.extract_strided_slice %264 {offsets = [0, 256], sizes = [8, 128], strides = [1, 1]} : vector<8x384xf32> to vector<8x128xf32>
    %285 = vector.extract_strided_slice %267 {offsets = [0, 256], sizes = [8, 128], strides = [1, 1]} : vector<8x384xf32> to vector<8x128xf32>
    %286 = arith.mulf %275, %285 : vector<8x128xf32>
    %287 = arith.addf %284, %286 : vector<8x128xf32>
    %288 = math.tanh %287 : vector<8x128xf32>
    %cst_69 = arith.constant 1.000000e+00 : f32
    %289 = vector.broadcast %cst_69 : f32 to vector<8x128xf32>
    %290 = arith.subf %289, %283 : vector<8x128xf32>
    %291 = arith.mulf %290, %288 : vector<8x128xf32>
    %292 = arith.mulf %283, %259 : vector<8x128xf32>
    %293 = arith.addf %291, %292 : vector<8x128xf32>
    %294 = arith.addi %18, %c5_i32 : i32
    %295 = vector.broadcast %294 : i32 to vector<8x1xi32>
    %296 = arith.cmpi slt, %295, %17 : vector<8x1xi32>
    %cst_70 = arith.constant 0.000000e+00 : f32
    %297 = vector.shape_cast %296 : vector<8x1xi1> to vector<8x1xi1>
    %298 = vector.broadcast %297 : vector<8x1xi1> to vector<8x128xi1>
    %299 = vector.broadcast %cst_70 : f32 to vector<8x128xf32>
    %300 = arith.select %298, %293, %299 : vector<8x128xi1>, vector<8x128xf32>
    %301 = arith.index_cast %c5_i32 : i32 to index
    %c0_71 = arith.constant 0 : index
    %c0_72 = arith.constant 0 : index
    %302 = vector.load %arg8[%301, %c0_71, %c0_72] : memref<8x8x128xf32, #tpu.memory_space<vmem>>, vector<1x8x128xf32>
    %303 = vector.shape_cast %302 : vector<1x8x128xf32> to vector<8x128xf32>
    %304 = vector.shape_cast %300 : vector<8x128xf32> to vector<1x8x128xf32>
    tpu.vector_store %arg8[%301, %c0_71, %c0_72], %304 {strides = array<i32>} : memref<8x8x128xf32, #tpu.memory_space<vmem>>, vector<1x8x128xf32>,
    %305 = vector.shape_cast %296 : vector<8x1xi1> to vector<8x1xi1>
    %306 = vector.broadcast %305 : vector<8x1xi1> to vector<8x128xi1>
    %307 = arith.select %306, %293, %259 : vector<8x128xi1>, vector<8x128xf32>
    %c6_i32 = arith.constant 6 : i32
    %308 = arith.index_cast %c6_i32 : i32 to index
    %c0_73 = arith.constant 0 : index
    %c0_74 = arith.constant 0 : index
    %309 = vector.load %arg9[%308, %c0_73, %c0_74] : memref<8x8x384xbf16, #tpu.memory_space<vmem>>, vector<1x8x384xbf16>
    %310 = vector.shape_cast %309 : vector<1x8x384xbf16> to vector<8x384xbf16>
    %311 = arith.extf %310 : vector<8x384xbf16> to vector<8x384xf32>
    %312 = arith.addf %311, %13 : vector<8x384xf32>
    %313 = arith.truncf %307 : vector<8x128xf32> to vector<8x128xbf16>
    %cst_75 = arith.constant dense<0.000000e+00> : vector<8x384xf32>
    %314 = tpu.matmul %313, %10, %cst_75 {dimension_numbers = #tpu.dot_dimension_numbers<[1], [0], [0], [1], [0, 0, 1, 1], [], []>} : vector<8x128xbf16>, vector<128x384xbf16>, vector<8x384xf32> -> vector<8x384xf32>
    %315 = arith.addf %314, %16 : vector<8x384xf32>
    %316 = vector.extract_strided_slice %312 {offsets = [0, 0], sizes = [8, 128], strides = [1, 1]} : vector<8x384xf32> to vector<8x128xf32>
    %317 = vector.extract_strided_slice %315 {offsets = [0, 0], sizes = [8, 128], strides = [1, 1]} : vector<8x384xf32> to vector<8x128xf32>
    %318 = arith.addf %316, %317 : vector<8x128xf32>
    %319 = arith.negf %318 : vector<8x128xf32>
    %320 = math.exp %319 : vector<8x128xf32>
    %cst_76 = arith.constant 1.000000e+00 : f32
    %321 = vector.broadcast %cst_76 : f32 to vector<8x128xf32>
    %322 = arith.addf %321, %320 : vector<8x128xf32>
    %323 = arith.divf %321, %322 : vector<8x128xf32>
    %324 = vector.extract_strided_slice %312 {offsets = [0, 128], sizes = [8, 128], strides = [1, 1]} : vector<8x384xf32> to vector<8x128xf32>
    %325 = vector.extract_strided_slice %315 {offsets = [0, 128], sizes = [8, 128], strides = [1, 1]} : vector<8x384xf32> to vector<8x128xf32>
    %326 = arith.addf %324, %325 : vector<8x128xf32>
    %327 = arith.negf %326 : vector<8x128xf32>
    %328 = math.exp %327 : vector<8x128xf32>
    %cst_77 = arith.constant 1.000000e+00 : f32
    %329 = vector.broadcast %cst_77 : f32 to vector<8x128xf32>
    %330 = arith.addf %329, %328 : vector<8x128xf32>
    %331 = arith.divf %329, %330 : vector<8x128xf32>
    %332 = vector.extract_strided_slice %312 {offsets = [0, 256], sizes = [8, 128], strides = [1, 1]} : vector<8x384xf32> to vector<8x128xf32>
    %333 = vector.extract_strided_slice %315 {offsets = [0, 256], sizes = [8, 128], strides = [1, 1]} : vector<8x384xf32> to vector<8x128xf32>
    %334 = arith.mulf %323, %333 : vector<8x128xf32>
    %335 = arith.addf %332, %334 : vector<8x128xf32>
    %336 = math.tanh %335 : vector<8x128xf32>
    %cst_78 = arith.constant 1.000000e+00 : f32
    %337 = vector.broadcast %cst_78 : f32 to vector<8x128xf32>
    %338 = arith.subf %337, %331 : vector<8x128xf32>
    %339 = arith.mulf %338, %336 : vector<8x128xf32>
    %340 = arith.mulf %331, %307 : vector<8x128xf32>
    %341 = arith.addf %339, %340 : vector<8x128xf32>
    %342 = arith.addi %18, %c6_i32 : i32
    %343 = vector.broadcast %342 : i32 to vector<8x1xi32>
    %344 = arith.cmpi slt, %343, %17 : vector<8x1xi32>
    %cst_79 = arith.constant 0.000000e+00 : f32
    %345 = vector.shape_cast %344 : vector<8x1xi1> to vector<8x1xi1>
    %346 = vector.broadcast %345 : vector<8x1xi1> to vector<8x128xi1>
    %347 = vector.broadcast %cst_79 : f32 to vector<8x128xf32>
    %348 = arith.select %346, %341, %347 : vector<8x128xi1>, vector<8x128xf32>
    %349 = arith.index_cast %c6_i32 : i32 to index
    %c0_80 = arith.constant 0 : index
    %c0_81 = arith.constant 0 : index
    %350 = vector.load %arg8[%349, %c0_80, %c0_81] : memref<8x8x128xf32, #tpu.memory_space<vmem>>, vector<1x8x128xf32>
    %351 = vector.shape_cast %350 : vector<1x8x128xf32> to vector<8x128xf32>
    %352 = vector.shape_cast %348 : vector<8x128xf32> to vector<1x8x128xf32>
    tpu.vector_store %arg8[%349, %c0_80, %c0_81], %352 {strides = array<i32>} : memref<8x8x128xf32, #tpu.memory_space<vmem>>, vector<1x8x128xf32>,
    %353 = vector.shape_cast %344 : vector<8x1xi1> to vector<8x1xi1>
    %354 = vector.broadcast %353 : vector<8x1xi1> to vector<8x128xi1>
    %355 = arith.select %354, %341, %307 : vector<8x128xi1>, vector<8x128xf32>
    %c7_i32 = arith.constant 7 : i32
    %356 = arith.index_cast %c7_i32 : i32 to index
    %c0_82 = arith.constant 0 : index
    %c0_83 = arith.constant 0 : index
    %357 = vector.load %arg9[%356, %c0_82, %c0_83] : memref<8x8x384xbf16, #tpu.memory_space<vmem>>, vector<1x8x384xbf16>
    %358 = vector.shape_cast %357 : vector<1x8x384xbf16> to vector<8x384xbf16>
    %359 = arith.extf %358 : vector<8x384xbf16> to vector<8x384xf32>
    %360 = arith.addf %359, %13 : vector<8x384xf32>
    %361 = arith.truncf %355 : vector<8x128xf32> to vector<8x128xbf16>
    %cst_84 = arith.constant dense<0.000000e+00> : vector<8x384xf32>
    %362 = tpu.matmul %361, %10, %cst_84 {dimension_numbers = #tpu.dot_dimension_numbers<[1], [0], [0], [1], [0, 0, 1, 1], [], []>} : vector<8x128xbf16>, vector<128x384xbf16>, vector<8x384xf32> -> vector<8x384xf32>
    %363 = arith.addf %362, %16 : vector<8x384xf32>
    %364 = vector.extract_strided_slice %360 {offsets = [0, 0], sizes = [8, 128], strides = [1, 1]} : vector<8x384xf32> to vector<8x128xf32>
    %365 = vector.extract_strided_slice %363 {offsets = [0, 0], sizes = [8, 128], strides = [1, 1]} : vector<8x384xf32> to vector<8x128xf32>
    %366 = arith.addf %364, %365 : vector<8x128xf32>
    %367 = arith.negf %366 : vector<8x128xf32>
    %368 = math.exp %367 : vector<8x128xf32>
    %cst_85 = arith.constant 1.000000e+00 : f32
    %369 = vector.broadcast %cst_85 : f32 to vector<8x128xf32>
    %370 = arith.addf %369, %368 : vector<8x128xf32>
    %371 = arith.divf %369, %370 : vector<8x128xf32>
    %372 = vector.extract_strided_slice %360 {offsets = [0, 128], sizes = [8, 128], strides = [1, 1]} : vector<8x384xf32> to vector<8x128xf32>
    %373 = vector.extract_strided_slice %363 {offsets = [0, 128], sizes = [8, 128], strides = [1, 1]} : vector<8x384xf32> to vector<8x128xf32>
    %374 = arith.addf %372, %373 : vector<8x128xf32>
    %375 = arith.negf %374 : vector<8x128xf32>
    %376 = math.exp %375 : vector<8x128xf32>
    %cst_86 = arith.constant 1.000000e+00 : f32
    %377 = vector.broadcast %cst_86 : f32 to vector<8x128xf32>
    %378 = arith.addf %377, %376 : vector<8x128xf32>
    %379 = arith.divf %377, %378 : vector<8x128xf32>
    %380 = vector.extract_strided_slice %360 {offsets = [0, 256], sizes = [8, 128], strides = [1, 1]} : vector<8x384xf32> to vector<8x128xf32>
    %381 = vector.extract_strided_slice %363 {offsets = [0, 256], sizes = [8, 128], strides = [1, 1]} : vector<8x384xf32> to vector<8x128xf32>
    %382 = arith.mulf %371, %381 : vector<8x128xf32>
    %383 = arith.addf %380, %382 : vector<8x128xf32>
    %384 = math.tanh %383 : vector<8x128xf32>
    %cst_87 = arith.constant 1.000000e+00 : f32
    %385 = vector.broadcast %cst_87 : f32 to vector<8x128xf32>
    %386 = arith.subf %385, %379 : vector<8x128xf32>
    %387 = arith.mulf %386, %384 : vector<8x128xf32>
    %388 = arith.mulf %379, %355 : vector<8x128xf32>
    %389 = arith.addf %387, %388 : vector<8x128xf32>
    %390 = arith.addi %18, %c7_i32 : i32
    %391 = vector.broadcast %390 : i32 to vector<8x1xi32>
    %392 = arith.cmpi slt, %391, %17 : vector<8x1xi32>
    %cst_88 = arith.constant 0.000000e+00 : f32
    %393 = vector.shape_cast %392 : vector<8x1xi1> to vector<8x1xi1>
    %394 = vector.broadcast %393 : vector<8x1xi1> to vector<8x128xi1>
    %395 = vector.broadcast %cst_88 : f32 to vector<8x128xf32>
    %396 = arith.select %394, %389, %395 : vector<8x128xi1>, vector<8x128xf32>
    %397 = arith.index_cast %c7_i32 : i32 to index
    %c0_89 = arith.constant 0 : index
    %c0_90 = arith.constant 0 : index
    %398 = vector.load %arg8[%397, %c0_89, %c0_90] : memref<8x8x128xf32, #tpu.memory_space<vmem>>, vector<1x8x128xf32>
    %399 = vector.shape_cast %398 : vector<1x8x128xf32> to vector<8x128xf32>
    %400 = vector.shape_cast %396 : vector<8x128xf32> to vector<1x8x128xf32>
    tpu.vector_store %arg8[%397, %c0_89, %c0_90], %400 {strides = array<i32>} : memref<8x8x128xf32, #tpu.memory_space<vmem>>, vector<1x8x128xf32>,
    %401 = vector.shape_cast %392 : vector<8x1xi1> to vector<8x1xi1>
    %402 = vector.broadcast %401 : vector<8x1xi1> to vector<8x128xi1>
    %403 = arith.select %402, %389, %355 : vector<8x128xi1>, vector<8x128xf32>
    %c8_i32_91 = arith.constant 8 : i32
    %c0_92 = arith.constant 0 : index
    %c0_93 = arith.constant 0 : index
    %404 = vector.load %arg10[%c0_92, %c0_93] : memref<8x128xf32, #tpu.memory_space<vmem>>, vector<8x128xf32>
    tpu.vector_store %arg10[%c0_92, %c0_93], %403 {strides = array<i32>} : memref<8x128xf32, #tpu.memory_space<vmem>>, vector<8x128xf32>,
    return
  }
  func.func @transform_0(%arg0: i32, %arg1: i32) -> (i32, i32) {
    %c0_i32 = arith.constant 0 : i32
    %c0_i32_0 = arith.constant 0 : i32
    return %arg0, %c0_i32 : i32, i32
  }
  func.func @transform_1(%arg0: i32, %arg1: i32) -> (i32, i32, i32) {
    %c0_i32 = arith.constant 0 : i32
    %c0_i32_0 = arith.constant 0 : i32
    return %arg1, %arg0, %c0_i32 : i32, i32, i32
  }
  func.func @transform_2(%arg0: i32, %arg1: i32) -> (i32, i32) {
    %c0_i32 = arith.constant 0 : i32
    %c0_i32_0 = arith.constant 0 : i32
    %c0_i32_1 = arith.constant 0 : i32
    return %c0_i32, %c0_i32_0 : i32, i32
  }
  func.func @transform_3(%arg0: i32, %arg1: i32) -> (i32, i32) {
    %c0_i32 = arith.constant 0 : i32
    %c0_i32_0 = arith.constant 0 : i32
    %c0_i32_1 = arith.constant 0 : i32
    return %c0_i32, %c0_i32_0 : i32, i32
  }
  func.func @transform_4(%arg0: i32, %arg1: i32) -> (i32, i32) {
    %c0_i32 = arith.constant 0 : i32
    %c0_i32_0 = arith.constant 0 : i32
    %c0_i32_1 = arith.constant 0 : i32
    return %c0_i32, %c0_i32_0 : i32, i32
  }
  func.func @transform_5(%arg0: i32, %arg1: i32) -> (i32, i32) {
    %c0_i32 = arith.constant 0 : i32
    %c0_i32_0 = arith.constant 0 : i32
    %c0_i32_1 = arith.constant 0 : i32
    return %c0_i32, %c0_i32_0 : i32, i32
  }
  func.func @transform_6(%arg0: i32, %arg1: i32) -> (i32, i32, i32) {
    %c0_i32 = arith.constant 0 : i32
    %c0_i32_0 = arith.constant 0 : i32
    return %arg1, %arg0, %c0_i32 : i32, i32, i32
  }
}

</mosaic_0001>

<bundles_post_ra>
// kernel: tpu_custom_call.1
= control target key start
LH: loop header
LB: loop body
LE: loop exit
PB: predicated region body
PF: predicated region fallthrough
CT: control target
= control target key end

     0   :  { %11 = vsyncpa [#allocation5], 0  ;;  %s2427_s0 = inlined_call_operand.vmem [shape: s32[8,1], index: 0, kind: input, shape index: {}]   ;;  %s2428_s1 = inlined_call_operand.hbm [shape: bf16[8,8,128], index: 1, kind: input, shape index: {}]   ;;  %s2429_s2 = inlined_call_operand.hbm [shape: bf16[128,384], index: 2, kind: input, shape index: {}]   ;;  %s2430_s3 = inlined_call_operand.hbm [shape: bf16[128,384], index: 3, kind: input, shape index: {}]   ;;  %s2431_s4 = inlined_call_operand.vmem [shape: f32[1,384], index: 4, kind: input, shape index: {}]   ;;  %s2432_s5 = inlined_call_operand.vmem [shape: f32[1,384], index: 5, kind: input, shape index: {}]   ;;  %s2433_s6 = inlined_call_operand.hbm [shape: f32[8,8,128], index: 6, kind: output, shape index: {}]  }
   0x1   :  { %12 = vsyncpa [#allocation8], 0  ;;  %s33_s23 = sshll.u32 %s2429_s2, 4  ;;  %s34_s23 = int_to_ptr.hbm [resolvable:$true] %s33_s23 }
   0x2   :  { %13 = vsyncpa [#allocation6], 0  ;;  %s1938_s24 = smov [#allocation7]   ;;  %s20_s28 = sshll.u32 %s2428_s1, 4  ;;  %s21_s28 = int_to_ptr.hbm [resolvable:$true] %s20_s28 }
   0x3   :  { %s35_s25 = sshll.u32 %s1938_s24, 4  ;;  %s1939_s29 = smov 192   ;;  %s36_s25 = int_to_ptr.vmem [resolvable:$true] %s35_s25 }
   0x4   :  { %s1940_s30 = smov 12   ;;  %s1941_s7 = smov [#allocation4]  }
   0x5   :  { %41 = dma.hbm_to_vmem [thread:$0]  %s34_s23, 3072, %s36_s25, [#allocation8], %s1939_s29, %s1939_s29, %s1940_s30  }
   0x6   :  { %s22_s8 = sshll.u32 %s1941_s7, 4  ;;  %s1942_s9 = smov 64   ;;  %s23_s8 = int_to_ptr.vmem [resolvable:$true] %s22_s8 }
   0x7   :  { %s1943_s10 = smov 4   ;;  %s46_s12 = sshll.u32 %s2430_s3, 4  ;;  %s47_s12 = int_to_ptr.hbm [resolvable:$true] %s46_s12 }
   0x8   :  { %28 = dma.hbm_to_vmem [thread:$0]  %s21_s28, 512, %s23_s8, [#allocation5], %s1942_s9, %s1942_s9, %s1943_s10  }
   0x9   :  { %s1944_s13 = smov [#allocation9]  }
   0xa   :  { %s48_s14 = sshll.u32 %s1944_s13, 4  ;;  %s49_s14 = int_to_ptr.vmem [resolvable:$true] %s48_s14 }
   0xb   :  { %54 = dma.hbm_to_vmem [thread:$0]  %s47_s12, 3072, %s49_s14, [#allocation8], %s1939_s29, %s1939_s29, %s1940_s30  }
   0xc   :  { %1932 = dma.done.wait [#allocation5], 512  }
   0xd   :  { %1933 = vsyncadd [#allocation5], 4294966784 }
   0xe   :  { %1934 = dma.done.wait [#allocation8], 6144  }
   0xf   :  { %1935 = vsyncadd [#allocation8], 4294961152  ;;  %v1550_v0 = vld [vmem:[#allocation7 + $0xa8] sm:$0xf]  ;;  %v1706_v1 = vld [vmem:[#allocation7 + $0xb0] sm:$0xf0] }
  0x10   :  { %v1705_v2 = vld [vmem:[#allocation7 + $0xac] sm:$0xf]  ;;  %v1551_v3 = vor.u32 %v1706_v1, %v1550_v0  ;;  %v1552_v4 = vld [vmem:[#allocation7 + $0xb4] sm:$0xf0]  ;;  %v1646_v5 = vld [vmem:[#allocation9 + $0xa8] sm:$0xf] }
  0x11   :  { %v1730_v6 = vld [vmem:[#allocation9 + $0xb0] sm:$0xf0]  ;;  %v1555_v7 = vor.u32 %v1705_v2, %v1552_v4  ;;  %v1538_v9 = vld [vmem:[#allocation7 + $0x90] sm:$0xf]  ;;  %v1703_v10 = vld [vmem:[#allocation7 + $0x98] sm:$0xf0] }
  0x12   :  { %v1994_v8 = vor.u32 %v1730_v6, %v1646_v5  ;;  %v1702_v11 = vld [vmem:[#allocation7 + $0x94] sm:$0xf]  ;;  %263 = vmatpush.bf16.msra.mxu0 %v1551_v3  ;;  %v1539_v12 = vor.u32 %v1703_v10, %v1538_v9  ;;  %v1540_v13 = vld [vmem:[#allocation7 + $0x9c] sm:$0xf0]  ;;  %v1634_v14 = vld [vmem:[#allocation9 + $0x90] sm:$0xf] }
  0x13   :  { %v1727_v15 = vld [vmem:[#allocation9 + $0x98] sm:$0xf0]  ;;  %292 = vmatpush.bf16.msra.mxu1 %v1555_v7  ;;  %v1543_v16 = vor.u32 %v1702_v11, %v1540_v13  ;;  %v1526_v18 = vld [vmem:[#allocation7 + $0x78] sm:$0xf]  ;;  %v1700_v19 = vld [vmem:[#allocation7 + $0x80] sm:$0xf0] }
  0x14   :  { %575 = vmatpush.bf16.msra.mxu3 %v1994_v8  ;;  %v1997_v17 = vor.u32 %v1727_v15, %v1634_v14  ;;  %v1699_v20 = vld [vmem:[#allocation7 + $0x7c] sm:$0xf]  ;;  %v1528_v21 = vld [vmem:[#allocation7 + $0x84] sm:$0xf0]  ;;  %v1622_v22 = vld [vmem:[#allocation9 + $0x78] sm:$0xf]  ;;  %v1527_v24 = vor.u32 %v1700_v19, %v1526_v18 }
  0x15   :  { %v1724_v23 = vld [vmem:[#allocation9 + $0x80] sm:$0xf0]  ;;  %v1531_v25 = vor.u32 %v1699_v20, %v1528_v21  ;;  %v1514_v27 = vld [vmem:[#allocation7 + $0x60] sm:$0xf]  ;;  %v1697_v28 = vld [vmem:[#allocation7 + $0x68] sm:$0xf0] }
  0x16   :  { %264 = vmatpush.bf16.msra.mxu0 %v1539_v12  ;;  %v2000_v26 = vor.u32 %v1724_v23, %v1622_v22  ;;  %v1696_v29 = vld [vmem:[#allocation7 + $0x64] sm:$0xf]  ;;  %v1516_v30 = vld [vmem:[#allocation7 + $0x6c] sm:$0xf0]  ;;  %v1610_v31 = vld [vmem:[#allocation9 + $0x60] sm:$0xf]  ;;  %v1515_v33 = vor.u32 %v1697_v28, %v1514_v27 }
  0x17   :  { %293 = vmatpush.bf16.msra.mxu1 %v1543_v16  ;;  %v1721_v32 = vld [vmem:[#allocation9 + $0x68] sm:$0xf0]  ;;  %v1519_v34 = vor.u32 %v1696_v29, %v1516_v30  ;;  %v1502_v36 = vld [vmem:[#allocation7 + $0x48] sm:$0xf]  ;;  %v1694_v37 = vld [vmem:[#allocation7 + $0x50] sm:$0xf0] }
  0x18   :  { %576 = vmatpush.bf16.msra.mxu3 %v1997_v17  ;;  %v2003_v35 = vor.u32 %v1721_v32, %v1610_v31  ;;  %v1693_v38 = vld [vmem:[#allocation7 + $0x4c] sm:$0xf]  ;;  %v1504_v39 = vld [vmem:[#allocation7 + $0x54] sm:$0xf0]  ;;  %v1598_v40 = vld [vmem:[#allocation9 + $0x48] sm:$0xf]  ;;  %v1503_v42 = vor.u32 %v1694_v37, %v1502_v36 }
  0x19   :  { %v1718_v41 = vld [vmem:[#allocation9 + $0x50] sm:$0xf0]  ;;  %v1507_v43 = vor.u32 %v1693_v38, %v1504_v39  ;;  %v1490_v45 = vld [vmem:[#allocation7 + $0x30] sm:$0xf]  ;;  %v1691_v46 = vld [vmem:[#allocation7 + $0x38] sm:$0xf0] }
  0x1a   :  { %265 = vmatpush.bf16.msra.mxu0 %v1527_v24  ;;  %v2006_v44 = vor.u32 %v1718_v41, %v1598_v40  ;;  %v1690_v47 = vld [vmem:[#allocation7 + $0x34] sm:$0xf]  ;;  %v1492_v48 = vld [vmem:[#allocation7 + $0x3c] sm:$0xf0]  ;;  %v1586_v49 = vld [vmem:[#allocation9 + $0x30] sm:$0xf]  ;;  %v1491_v52 = vor.u32 %v1691_v46, %v1490_v45 }
  0x1b   :  { %294 = vmatpush.bf16.msra.mxu1 %v1531_v25  ;;  %v1715_v50 = vld [vmem:[#allocation9 + $0x38] sm:$0xf0]  ;;  %v1478_v51 = vld [vmem:[#allocation7 + $0x18] sm:$0xf]  ;;  %v1688_v53 = vld [vmem:[#allocation7 + $0x20] sm:$0xf0]  ;;  %v1495_v56 = vor.u32 %v1690_v47, %v1492_v48 }
  0x1c   :  { %577 = vmatpush.bf16.msra.mxu3 %v2000_v26  ;;  %v1687_v54 = vld [vmem:[#allocation7 + $0x1c] sm:$0xf]  ;;  %v1558_v55 = vld [vmem:[#allocation7 + $0xb0] sm:$0xf]  ;;  %v2009_v57 = vor.u32 %v1715_v50, %v1586_v49  ;;  %v1480_v58 = vld [vmem:[#allocation7 + $0x24] sm:$0xf0]  ;;  %v1479_v1 = vor.u32 %v1688_v53, %v1478_v51 }
  0x1d   :  { %v1574_v59 = vld [vmem:[#allocation9 + $0x18] sm:$0xf]  ;;  %v1707_v60 = vld [vmem:[#allocation7 + $0xb8] sm:$0xf0]  ;;  %v1712_v61 = vld [vmem:[#allocation9 + $0x20] sm:$0xf0]  ;;  %v1483_v6 = vor.u32 %v1687_v54, %v1480_v58 }
  0x1e   :  { %266 = vmatpush.bf16.msra.mxu0 %v1515_v33  ;;  %v1559_v62 = vor.u32 %v1707_v60, %v1558_v55  ;;  %v1546_v63 = vld [vmem:[#allocation7 + $0x98] sm:$0xf]  ;;  %v1704_v0 = vld [vmem:[#allocation7 + $0xa0] sm:$0xf0]  ;;  %v1466_v2 = vld [vmem:[#allocation7] sm:$0xf]  ;;  %v2012_v7 = vor.u32 %v1712_v61, %v1574_v59 }
  0x1f   :  { %295 = vmatpush.bf16.msra.mxu1 %v1519_v34  ;;  %v1685_v3 = vld [vmem:[#allocation7 + $0x8] sm:$0xf0]  ;;  %v1684_v4 = vld [vmem:[#allocation7 + $0x4] sm:$0xf]  ;;  %v1547_v5 = vor.u32 %v1704_v0, %v1546_v63  ;;  %v1468_v9 = vld [vmem:[#allocation7 + $0xc] sm:$0xf0] }
  0x20   :  { %578 = vmatpush.bf16.msra.mxu3 %v2003_v35  ;;  %321 = vmatpush.bf16.msra.mxu2 %v1559_v62  ;;  %v1534_v10 = vld [vmem:[#allocation7 + $0x80] sm:$0xf]  ;;  %v1701_v11 = vld [vmem:[#allocation7 + $0x88] sm:$0xf0]  ;;  %v1648_v15 = vld [vmem:[#allocation9 + $0xb4] sm:$0xf0]  ;;  %v1467_v19 = vor.u32 %v1685_v3, %v1466_v2  ;;  %v1471_v21 = vor.u32 %v1684_v4, %v1468_v9 }
  0x21   :  { %v1562_v12 = vld [vmem:[#allocation9] sm:$0xf]  ;;  %v1709_v13 = vld [vmem:[#allocation9 + $0x8] sm:$0xf0]  ;;  %v1654_v16 = vld [vmem:[#allocation9 + $0xb0] sm:$0xf]  ;;  %v1535_v20 = vor.u32 %v1701_v11, %v1534_v10 }
  0x22   :  { %267 = vmatpush.bf16.msra.mxu0 %v1503_v42  ;;  %v1729_v14 = vld [vmem:[#allocation9 + $0xac] sm:$0xf]  ;;  %v1731_v18 = vld [vmem:[#allocation9 + $0xb8] sm:$0xf0]  ;;  %v2015_v22 = vor.u32 %v1709_v13, %v1562_v12  ;;  %v2017_v23 = vld [vmem:[#allocation4] sm:$0xff]  ;;  %s1434_s20 = sshll.u32 %s2433_s6, 4  ;;  %s1435_s20 = int_to_ptr.hbm [resolvable:$true] %s1434_s20 }
  0x23   :  { %296 = vmatpush.bf16.msra.mxu1 %v1507_v43  ;;  %v2019_v24 = vor.u32 %v1729_v14, %v1648_v15  ;;  %v2021_v25 = vor.u32 %v1731_v18, %v1654_v16  ;;  %v1726_v27 = vld [vmem:[#allocation9 + $0x94] sm:$0xf]  ;;  %v1522_v28 = vld [vmem:[#allocation7 + $0x68] sm:$0xf]  ;;  %v1636_v30 = vld [vmem:[#allocation9 + $0x9c] sm:$0xf0] }
  0x24   :  { %579 = vmatpush.bf16.msra.mxu3 %v2006_v44  ;;  %322 = vmatpush.bf16.msra.mxu2 %v1547_v5  ;;  %v1698_v29 = vld [vmem:[#allocation7 + $0x70] sm:$0xf0]  ;;  %v1642_v31 = vld [vmem:[#allocation9 + $0x98] sm:$0xf]  ;;  %v1728_v32 = vld [vmem:[#allocation9 + $0xa0] sm:$0xf0]  ;;  %v2026_v34 = vor.u32 %v1726_v27, %v1636_v30 }
  0x25   :  { %v1523_v33 = vor.u32 %v1698_v29, %v1522_v28  ;;  %v1723_v36 = vld [vmem:[#allocation9 + $0x7c] sm:$0xf]  ;;  %v2028_v37 = vor.u32 %v1728_v32, %v1642_v31  ;;  %v1510_v38 = vld [vmem:[#allocation7 + $0x50] sm:$0xf]  ;;  %v1624_v40 = vld [vmem:[#allocation9 + $0x84] sm:$0xf0] }
  0x26   :  { %268 = vmatpush.bf16.msra.mxu0 %v1491_v52  ;;  %v1695_v39 = vld [vmem:[#allocation7 + $0x58] sm:$0xf0]  ;;  %v1630_v41 = vld [vmem:[#allocation9 + $0x80] sm:$0xf]  ;;  %v1725_v42 = vld [vmem:[#allocation9 + $0x88] sm:$0xf0]  ;;  %v2035_v46 = vor.u32 %v1723_v36, %v1624_v40 }
  0x27   :  { %297 = vmatpush.bf16.msra.mxu1 %v1495_v56  ;;  %v1945_v43 = vmov 0.0|0.0   ;;  %v1511_v45 = vor.u32 %v1695_v39, %v1510_v38  ;;  %v1720_v47 = vld [vmem:[#allocation9 + $0x64] sm:$0xf]  ;;  %v2038_v48 = vor.u32 %v1725_v42, %v1630_v41  ;;  %v1498_v49 = vld [vmem:[#allocation7 + $0x38] sm:$0xf]  ;;  %v2048_v0 = vld [vmem:[#allocation4 + $0x8] sm:$0xff] }
  0x28   :  { %580 = vmatpush.bf16.msra.mxu3 %v2009_v57  ;;  %323 = vmatpush.bf16.msra.mxu2 %v1535_v20  ;;  %v1692_v50 = vld [vmem:[#allocation7 + $0x40] sm:$0xf0]  ;;  %v1612_v51 = vld [vmem:[#allocation9 + $0x6c] sm:$0xf0]  ;;  %v1618_v52 = vld [vmem:[#allocation9 + $0x68] sm:$0xf] }
  0x29   :  { %v1722_v53 = vld [vmem:[#allocation9 + $0x70] sm:$0xf0]  ;;  %v1499_v54 = vor.u32 %v1692_v50, %v1498_v49  ;;  %v2042_v55 = vor.u32 %v1720_v47, %v1612_v51  ;;  %v1717_v56 = vld [vmem:[#allocation9 + $0x4c] sm:$0xf]  ;;  %v1486_v59 = vld [vmem:[#allocation7 + $0x20] sm:$0xf] }
  0x2a   :  { %269 = vmatpush.bf16.msra.mxu0 %v1479_v1  ;;  %v2045_v58 = vor.u32 %v1722_v53, %v1618_v52  ;;  %v1689_v60 = vld [vmem:[#allocation7 + $0x28] sm:$0xf0]  ;;  %v1600_v61 = vld [vmem:[#allocation9 + $0x54] sm:$0xf0]  ;;  %v1606_v62 = vld [vmem:[#allocation9 + $0x50] sm:$0xf] }
  0x2b   :  { %298 = vmatpush.bf16.msra.mxu1 %v1483_v6  ;;  %v1719_v63 = vld [vmem:[#allocation9 + $0x58] sm:$0xf0]  ;;  %v1487_v1 = vor.u32 %v1689_v60, %v1486_v59  ;;  %v2051_v2 = vor.u32 %v1717_v56, %v1600_v61  ;;  %v1714_v3 = vld [vmem:[#allocation9 + $0x34] sm:$0xf]  ;;  %v1474_v5 = vld [vmem:[#allocation7 + $0x8] sm:$0xf] }
  0x2c   :  { %581 = vmatpush.bf16.msra.mxu3 %v2012_v7  ;;  %324 = vmatpush.bf16.msra.mxu2 %v1523_v33  ;;  %v2054_v4 = vor.u32 %v1719_v63, %v1606_v62  ;;  %v1686_v6 = vld [vmem:[#allocation7 + $0x10] sm:$0xf0]  ;;  %v1588_v9 = vld [vmem:[#allocation9 + $0x3c] sm:$0xf0]  ;;  %v1594_v10 = vld [vmem:[#allocation9 + $0x38] sm:$0xf] }
  0x2d   :  { %v1716_v11 = vld [vmem:[#allocation9 + $0x40] sm:$0xf0]  ;;  %v1475_v12 = vor.u32 %v1686_v6, %v1474_v5  ;;  %v2058_v13 = vor.u32 %v1714_v3, %v1588_v9  ;;  %v1711_v15 = vld [vmem:[#allocation9 + $0x1c] sm:$0xf]  ;;  %v1576_v16 = vld [vmem:[#allocation9 + $0x24] sm:$0xf0] }
  0x2e   :  { %270 = vmatpush.bf16.msra.mxu0 %v1467_v19  ;;  %v2061_v14 = vor.u32 %v1716_v11, %v1594_v10  ;;  %v1582_v18 = vld [vmem:[#allocation9 + $0x20] sm:$0xf]  ;;  %v1713_v19 = vld [vmem:[#allocation9 + $0x28] sm:$0xf0]  ;;  %v2067_v20 = vor.u32 %v1711_v15, %v1576_v16  ;;  %v1564_v28 = vld [vmem:[#allocation9 + $0xc] sm:$0xf0] }
  0x2f   :  { %299 = vmatpush.bf16.msra.mxu1 %v1471_v21  ;;  %v1708_v21 = vld [vmem:[#allocation9 + $0x4] sm:$0xf]  ;;  %v2070_v27 = vor.u32 %v1713_v19, %v1582_v18  ;;  %v1570_v29 = vld [vmem:[#allocation9 + $0x8] sm:$0xf]  ;;  %v1710_v30 = vld [vmem:[#allocation9 + $0x10] sm:$0xf0] }
  0x30   :  { %582 = vmatpush.bf16.msra.mxu3 %v2015_v22  ;;  %325 = vmatpush.bf16.msra.mxu2 %v1511_v45  ;;  %v2076_v31 = vor.u32 %v1708_v21, %v1564_v28  ;;  %v2079_v32 = vor.u32 %v1710_v30, %v1570_v29  ;;  %v1682_v33 = vld [vmem:[#allocation4 + $0x10] sm:$0xff]  ;;  %v1946_v36 = vmov 0   ;;  %v1683_v40 = vld [vmem:[#allocation4 + $0x18] sm:$0xff]  ;;  %v2160_v47 = vld [vmem:[%s2432_s5] sm:$0x7]  ;;  %s1948_s21 = smov 128  }
  0x31   :  { %271 = vmatmul.bf16.vlgmr.msra.gmra.mxu0 %v2017_v23  ;;  %1753 = vset.pattern.permute.xlu0 %v1946_v36  ;;  %v2165_v51 = vld [vmem:[%s2431_s4] sm:$0x7]  ;;  %v2168_v53 = vperm.slane %v2160_v47, 0  ;;  %s1947_s4 = smov [#allocation10]   ;;  %s1949_s22 = smov 8  }
  0x32   :  { %601 = vmatpush.bf16.msrb.mxu0 %v2021_v25  ;;  %300 = vmatmul.bf16.vlgmr.msra.gmra.mxu1 %v2017_v23  ;;  %v2171_v56 = vperm.slane %v2165_v51, 0  ;;  %v2174_v60 = vperm.slane %v2165_v51, 1  ;;  %s1432_s5 = sshll.u32 %s1947_s4, 4  ;;  %s1433_s5 = int_to_ptr.vmem [resolvable:$true] %s1432_s5 }
  0x33   :  { %681 = vmatpush.bf16.msrb.mxu1 %v1994_v8  ;;  %583 = vmatmul.bf16.vlgmr.msra.gmra.mxu3 %v1945_v43 }
  0x34   :  { %588 = vmatpush.bf16.msrb.mxu3 %v2019_v24  ;;  %326 = vmatpush.bf16.msra.mxu2 %v1499_v54 }
  0x35   :  { %1754 = vset.pattern.permute.xlu1 %v1946_v36  ;;  %1755 = vset.pattern.permute.xlu2 %v1946_v36 }
  0x36   :  { %602 = vmatpush.bf16.msrb.mxu0 %v2028_v37 }
  0x37   :  { %682 = vmatpush.bf16.msrb.mxu1 %v1997_v17 }
  0x38   :  { %589 = vmatpush.bf16.msrb.mxu3 %v2026_v34  ;;  %327 = vmatpush.bf16.msra.mxu2 %v1487_v1 }
  0x3a   :  { %603 = vmatpush.bf16.msrb.mxu0 %v2038_v48 }
  0x3b   :  { %683 = vmatpush.bf16.msrb.mxu1 %v2000_v26 }
  0x3c   :  { %590 = vmatpush.bf16.msrb.mxu3 %v2035_v46  ;;  %328 = vmatpush.bf16.msra.mxu2 %v1475_v12 }
  0x3e   :  { %604 = vmatpush.bf16.msrb.mxu0 %v2045_v58 }
  0x3f   :  { %684 = vmatpush.bf16.msrb.mxu1 %v2003_v35  ;;  %329 = vmatmul.bf16.vlgmr.msra.gmra.mxu2 %v2017_v23  ;;  %v2094_v23 = vld [vmem:[%s2427_s0] sm:$0xff] }
  0x40   :  { %591 = vmatpush.bf16.msrb.mxu3 %v2042_v55  ;;  %694 = vmatpush.bf16.msrb.mxu2 %v2019_v24  ;;  %vm1658_vm0 = vcmp.gt.s32.totalorder %v2094_v23, 0  ;;  %vm1661_vm1 = vcmp.gt.s32.totalorder %v2094_v23, 1  ;;  %vm1676_vm2 = vcmp.gt.s32.totalorder %v2094_v23, 6  ;;  %vm1664_vm13 = vcmp.gt.s32.totalorder %v2094_v23, 2 }
  0x41   :  { %276 = vmatmul.bf16.gmra.mxu0 %v2048_v0  ;;  %v663_v38 = vsel %vm1658_vm0, 1, %v1946_v36  ;;  %v770_v39 = vsel %vm1661_vm1, 1, %v1946_v36  ;;  %v1310_v41 = vsel %vm1676_vm2, 1, %v1946_v36  ;;  %vm1667_vm14 = vcmp.gt.s32.totalorder %v2094_v23, 3 }
  0x42   :  { %605 = vmatpush.bf16.msrb.mxu0 %v2054_v4  ;;  %305 = vmatmul.bf16.gmra.mxu1 %v2048_v0 }
  0x43   :  { %685 = vmatpush.bf16.msrb.mxu1 %v2006_v44  ;;  %665 = vperm.xlu0 %1753, %v663_v38  }
  0x44   :  { %592 = vmatpush.bf16.msrb.mxu3 %v2051_v2  ;;  %695 = vmatpush.bf16.msrb.mxu2 %v2026_v34 }
  0x46   :  { %606 = vmatpush.bf16.msrb.mxu0 %v2061_v14 }
  0x47   :  { %686 = vmatpush.bf16.msrb.mxu1 %v2009_v57 }
  0x48   :  { %593 = vmatpush.bf16.msrb.mxu3 %v2058_v13  ;;  %696 = vmatpush.bf16.msrb.mxu2 %v2035_v46 }
  0x4a   :  { %607 = vmatpush.bf16.msrb.mxu0 %v2070_v27 }
  0x4b   :  { %687 = vmatpush.bf16.msrb.mxu1 %v2012_v7  ;;  %772 = vperm.xlu0 %1753, %v770_v39  }
  0x4c   :  { %594 = vmatpush.bf16.msrb.mxu3 %v2067_v20  ;;  %697 = vmatpush.bf16.msrb.mxu2 %v2042_v55 }
  0x4e   :  { %608 = vmatpush.bf16.msrb.mxu0 %v2079_v32 }
  0x4f   :  { %688 = vmatpush.bf16.msrb.mxu1 %v2015_v22  ;;  %334 = vmatmul.bf16.gmra.mxu2 %v2048_v0 }
  0x50   :  { %595 = vmatpush.bf16.msrb.mxu3 %v2076_v31  ;;  %698 = vmatpush.bf16.msrb.mxu2 %v2051_v2 }
  0x51   :  { %281 = vmatmul.bf16.gmra.mxu0 %v1682_v33 }
  0x52   :  { %789 = vmatpush.bf16.msra.mxu0 %v1994_v8  ;;  %310 = vmatmul.bf16.gmra.mxu1 %v1682_v33 }
  0x53   :  { %596 = vmatmul.bf16.vlgmr.msrb.gmra.mxu3 %v1945_v43  ;;  %802 = vmatpush.bf16.msra.mxu1 %v2019_v24 }
  0x54   :  { %707 = vmatpush.bf16.msra.mxu3 %v2021_v25  ;;  %699 = vmatpush.bf16.msrb.mxu2 %v2058_v13 }
  0x55   :  { %1312 = vperm.xlu0 %1753, %v1310_v41  }
  0x56   :  { %790 = vmatpush.bf16.msra.mxu0 %v1997_v17 }
  0x57   :  { %803 = vmatpush.bf16.msra.mxu1 %v2026_v34 }
  0x58   :  { %708 = vmatpush.bf16.msra.mxu3 %v2028_v37  ;;  %700 = vmatpush.bf16.msrb.mxu2 %v2067_v20 }
  0x5a   :  { %791 = vmatpush.bf16.msra.mxu0 %v2000_v26 }
  0x5b   :  { %804 = vmatpush.bf16.msra.mxu1 %v2035_v46 }
  0x5c   :  { %709 = vmatpush.bf16.msra.mxu3 %v2038_v48  ;;  %701 = vmatpush.bf16.msrb.mxu2 %v2076_v31 }
  0x5e   :  { %792 = vmatpush.bf16.msra.mxu0 %v2003_v35 }
  0x5f   :  { %805 = vmatpush.bf16.msra.mxu1 %v2042_v55  ;;  %339 = vmatmul.bf16.gmra.mxu2 %v1682_v33 }
  0x60   :  { %710 = vmatpush.bf16.msra.mxu3 %v2045_v58  ;;  %815 = vmatpush.bf16.msra.mxu2 %v2021_v25 }
  0x61   :  { %286 = vmatmul.bf16.gmra.mxu0 %v1683_v40 }
  0x62   :  { %793 = vmatpush.bf16.msra.mxu0 %v2006_v44  ;;  %315 = vmatmul.bf16.gmra.mxu1 %v1683_v40 }
  0x63   :  { %806 = vmatpush.bf16.msra.mxu1 %v2051_v2 }
  0x64   :  { %711 = vmatpush.bf16.msra.mxu3 %v2054_v4  ;;  %816 = vmatpush.bf16.msra.mxu2 %v2028_v37 }
  0x66   :  { %794 = vmatpush.bf16.msra.mxu0 %v2009_v57 }
  0x67   :  { %807 = vmatpush.bf16.msra.mxu1 %v2058_v13 }
  0x68   :  { %712 = vmatpush.bf16.msra.mxu3 %v2061_v14  ;;  %817 = vmatpush.bf16.msra.mxu2 %v2038_v48 }
  0x6a   :  { %795 = vmatpush.bf16.msra.mxu0 %v2012_v7 }
  0x6b   :  { %808 = vmatpush.bf16.msra.mxu1 %v2067_v20 }
  0x6c   :  { %713 = vmatpush.bf16.msra.mxu3 %v2070_v27  ;;  %818 = vmatpush.bf16.msra.mxu2 %v2045_v58 }
  0x6e   :  { %796 = vmatpush.bf16.msra.mxu0 %v2015_v22 }
  0x6f   :  { %809 = vmatpush.bf16.msra.mxu1 %v2076_v31  ;;  %344 = vmatmul.bf16.gmra.mxu2 %v1683_v40 }
  0x70   :  { %714 = vmatpush.bf16.msra.mxu3 %v2079_v32  ;;  %819 = vmatpush.bf16.msra.mxu2 %v2054_v4 }
  0x71   :  { %609 = vmatmul.bf16.vlgmr.msrb.gmra.mxu0 %v1945_v43 }
  0x72   :  { %910 = vmatpush.bf16.msrb.mxu0 %v2019_v24 }
  0x74   :  { %897 = vmatpush.bf16.msrb.mxu3 %v1994_v8  ;;  %820 = vmatpush.bf16.msra.mxu2 %v2061_v14 }
  0x76   :  { %911 = vmatpush.bf16.msrb.mxu0 %v2026_v34 }
  0x78   :  { %898 = vmatpush.bf16.msrb.mxu3 %v1997_v17  ;;  %821 = vmatpush.bf16.msra.mxu2 %v2070_v27 }
  0x7a   :  { %912 = vmatpush.bf16.msrb.mxu0 %v2035_v46 }
  0x7c   :  { %899 = vmatpush.bf16.msrb.mxu3 %v2000_v26  ;;  %822 = vmatpush.bf16.msra.mxu2 %v2079_v32 }
  0x7e   :  { %913 = vmatpush.bf16.msrb.mxu0 %v2042_v55 }
  0x80   :  { %900 = vmatpush.bf16.msrb.mxu3 %v2003_v35 }
  0x82   :  { %914 = vmatpush.bf16.msrb.mxu0 %v2051_v2 }
  0x84   :  { %901 = vmatpush.bf16.msrb.mxu3 %v2006_v44 }
  0x86   :  { %915 = vmatpush.bf16.msrb.mxu0 %v2058_v13 }
  0x88   :  { %902 = vmatpush.bf16.msrb.mxu3 %v2009_v57 }
  0x8a   :  { %916 = vmatpush.bf16.msrb.mxu0 %v2067_v20 }
  0x8c   :  { %903 = vmatpush.bf16.msrb.mxu3 %v2012_v7 }
  0x8e   :  { %917 = vmatpush.bf16.msrb.mxu0 %v2076_v31 }
  0x90   :  { %904 = vmatpush.bf16.msrb.mxu3 %v2015_v22 }
  0xae   :  { %v272_v42 = vpop.f32.mrf.mxu0 }
  0xaf   :  { %v301_v43 = vpop.f32.mrf.mxu1 }
  0xb0   :  { %v350_v45 = vpack.c.bf16 %v301_v43, %v272_v42 }
  0xb2   :  { %v440_v59 = vunpack.c.l.bf16 %v350_v45 }
  0xb4   :  { %v443_v3 = vadd.f32 %v440_v59, %v2171_v56 }
  0xb6   :  { %v584_v49 = vpop.f32.mrf.mxu3  ;;  %v274_v50 = vpop.f32.mrf.mxu0 }
  0xb7   :  { %v303_v52 = vpop.f32.mrf.mxu1  ;;  %v585_v63 = vadd.f32 %v584_v49, %v2168_v53 }
  0xb8   :  { %v352_v54 = vpack.c.bf16 %v303_v52, %v274_v50  ;;  %v2197_v50 = vperm.slane %v2160_v47, 1  ;;  %v441_v52 = vunpack.c.h.bf16 %v350_v45 }
  0xb9   :  { %v614_v9 = vadd.f32 %v585_v63, %v443_v3 }
  0xba   :  { %v674_v61 = vunpack.c.l.bf16 %v352_v54  ;;  %v675_v62 = vunpack.c.h.bf16 %v352_v54 }
  0xbb   :  { %v1656_v16 = vmul.f32 -1.442695, %v614_v9 }
  0xbc   :  { %v2178_v0 = vadd.f32 %v674_v61, %v2171_v56  ;;  %v2181_v1 = vadd.f32 %v675_v62, %v2174_v60 }
  0xbd   :  { %1756 = vpow2.f32 %v1656_v16 }
  0xbe   :  { %v586_v5 = vpop.f32.mrf.mxu3  ;;  %v277_v6 = vpop.f32.mrf.mxu0 }
  0xbf   :  { %v306_v10 = vpop.f32.mrf.mxu1 }
  0xc0   :  { %v354_v11 = vpack.c.bf16 %v306_v10, %v277_v6  ;;  %v444_v6 = vadd.f32 %v441_v52, %v2174_v60 }
  0xc2   :  { %v782_v12 = vunpack.c.l.bf16 %v354_v11  ;;  %v783_v15 = vunpack.c.h.bf16 %v354_v11  ;;  %v330_v30 = vpop.f32.mrf.mxu2 }
  0xc3   :  { %v351_v33 = vpack.c.bf16 %v330_v30, %v330_v30  ;;  %v1757_v41 = vpop.eup %1756 }
  0xc4   :  { %v2185_v18 = vadd.f32 %v782_v12, %v2171_v56  ;;  %v2188_v19 = vadd.f32 %v783_v15, %v2174_v60  ;;  %v2199_v54 = vadd.f32 1.0, %v1757_v41 }
  0xc5   :  { %367 = vst [vmem:[#allocation2 + $0x8] sm:$0xf] %v351_v33 }
  0xc6   :  { %v279_v21 = vpop.f32.mrf.mxu0  ;;  %1758 = vrcp.f32 %v2199_v54  ;;  %vm624_vm4 = vweird.f32 %v2199_v54 }
  0xc7   :  { %v308_v28 = vpop.f32.mrf.mxu1 }
  0xc8   :  { %v356_v29 = vpack.c.bf16 %v308_v28, %v279_v21 }
  0xca   :  { %v891_v38 = vunpack.c.h.bf16 %v356_v29  ;;  %v890_v39 = vunpack.c.l.bf16 %v356_v29  ;;  %v332_v61 = vpop.f32.mrf.mxu2 }
  0xcb   :  { %v353_v63 = vpack.c.bf16 %v332_v61, %v332_v61 }
  0xcc   :  { %v2191_v40 = vadd.f32 %v891_v38, %v2174_v60  ;;  %v2194_v42 = vadd.f32 %v890_v39, %v2171_v56  ;;  %v1759_v28 = vpop.eup %1758 }
  0xcd   :  { %369 = vst [vmem:[#allocation2 + $0x14] sm:$0xf] %v353_v63  ;;  %v620_v41 = vmul.f32 %v1759_v28, %v2199_v54  ;;  %vm625_vm3 = vweird.f32 %v1759_v28 }
  0xce   :  { %v282_v43 = vpop.f32.mrf.mxu0  ;;  %vm626_vm5 = vmor %vm624_vm4, %vm625_vm3  ;;  %vm1679_vm3 = vcmp.gt.s32.totalorder %v2094_v23, 7 }
  0xcf   :  { %v311_v49 = vpop.f32.mrf.mxu1 }
  0xd0   :  { %v358_v59 = vpack.c.bf16 %v311_v49, %v282_v43 }
  0xd2   :  { %v998_v3 = vunpack.c.l.bf16 %v358_v59  ;;  %v999_v5 = vunpack.c.h.bf16 %v358_v59  ;;  %v335_v63 = vpop.f32.mrf.mxu2 }
  0xd4   :  { %v2205_v10 = vadd.f32 %v998_v3, %v2171_v56  ;;  %v2208_v45 = vadd.f32 %v999_v5, %v2174_v60  ;;  %v355_v3 = vpack.c.bf16 %v335_v63, %v335_v63 }
  0xd6   :  { %v597_v62 = vpop.f32.mrf.mxu3  ;;  %v284_v12 = vpop.f32.mrf.mxu0  ;;  %371 = vst [vmem:[#allocation2 + $0x20] sm:$0xf] %v355_v3 }
  0xd7   :  { %v598_v9 = vadd.f32 %v597_v62, %v2197_v50  ;;  %v313_v16 = vpop.f32.mrf.mxu1  ;;  %v621_v62 = vsub.f32 1.0, %v620_v41  ;;  %v2224_v41 = vperm.slane %v2160_v47, 2 }
  0xd8   :  { %v360_v21 = vpack.c.bf16 %v313_v16, %v284_v12 }
  0xd9   :  { %v634_v11 = vadd.f32 %v598_v9, %v444_v6  ;;  %v622_v5 = vmul.f32 %v1759_v28, %v621_v62 }
  0xda   :  { %v1106_v30 = vunpack.c.l.bf16 %v360_v21  ;;  %v1107_v33 = vunpack.c.h.bf16 %v360_v21 }
  0xdb   :  { %v1657_v15 = vmul.f32 -1.442695, %v634_v11  ;;  %v623_v16 = vadd.f32 %v1759_v28, %v622_v5 }
  0xdc   :  { %v2211_v38 = vadd.f32 %v1106_v30, %v2171_v56  ;;  %v2214_v39 = vadd.f32 %v1107_v33, %v2174_v60  ;;  %v630_v30 = vand.u32 2147483648, %v2199_v54  ;;  %v2221_v33 = vperm.slane %v2165_v51, 2 }
  0xdd   :  { %1760 = vpow2.f32 %v1657_v15  ;;  %v439_v15 = vld [vmem:[#allocation2 + $0x8] sm:$0xf]  ;;  %v627_v62 = vsel %vm626_vm5, %v1759_v28, %v623_v16 }
  0xde   :  { %v599_v29 = vpop.f32.mrf.mxu3  ;;  %v287_v43 = vpop.f32.mrf.mxu0  ;;  %v631_v5 = vor.u32 1.1754944e-38, %v630_v30 }
  0xdf   :  { %v316_v52 = vpop.f32.mrf.mxu1  ;;  %v628_v29 = vand.u32 2147483647, %v2199_v54 }
  0xe0   :  { %v362_v61 = vpack.c.bf16 %v316_v52, %v287_v43  ;;  %v442_v43 = vunpack.c.l.bf16 %v439_v15  ;;  %v337_v52 = vpop.f32.mrf.mxu2 }
  0xe1   :  { %vm629_vm6 = vcmp.eq.f32.partialorder %v628_v29, 8.507059e+37 }
  0xe2   :  { %378 = vst [vmem:[#allocation2 + $0x48] sm:$0xff] %v362_v61  ;;  %v357_v61 = vpack.c.bf16 %v337_v52, %v337_v52  ;;  %v632_v51 = vsel %vm629_vm6, %v631_v5, %v627_v62  ;;  %v666_v62 = vpop.permute.xlu0 %665 }
  0xe3   :  { %v1761_v49 = vpop.eup %1760  ;;  %vm667_vm11 = vcmp.eq.s32.totalorder %v666_v62, 1 }
  0xe4   :  { %v638_v59 = vadd.f32 1.0, %v1761_v49  ;;  %373 = vst [vmem:[#allocation2 + $0x2c] sm:$0xf] %v357_v61  ;;  %vm1732_vm12 = vmpackc.low %vm667_vm11, %vm667_vm11 }
  0xe6   :  { %1762 = vrcp.f32 %v638_v59  ;;  %v289_v6 = vpop.f32.mrf.mxu0  ;;  %vm644_vm8 = vweird.f32 %v638_v59  ;;  %v648_v15 = vand.u32 2147483647, %v638_v59 }
  0xe7   :  { %v318_v9 = vpop.f32.mrf.mxu1 }
  0xe8   :  { %v364_v12 = vpack.c.bf16 %v318_v9, %v289_v6  ;;  %v445_v6 = vadd.f32 %v442_v43, %v2221_v33  ;;  %v340_v52 = vpop.f32.mrf.mxu2  ;;  %vm649_vm10 = vcmp.eq.f32.partialorder %v648_v15, 8.507059e+37 }
  0xe9   :  { %v359_v16 = vpack.c.bf16 %v340_v52, %v340_v52 }
  0xea   :  { %380 = vst [vmem:[#allocation2 + $0x54] sm:$0xff] %v364_v12  ;;  %v650_v12 = vand.u32 2147483648, %v638_v59 }
  0xeb   :  { %375 = vst [vmem:[#allocation2 + $0x38] sm:$0xf] %v359_v16 }
  0xec   :  { %v1763_v11 = vpop.eup %1762  ;;  %v651_v30 = vor.u32 1.1754944e-38, %v650_v12 }
  0xed   :  { %v640_v21 = vmul.f32 %v1763_v11, %v638_v59  ;;  %vm645_vm7 = vweird.f32 %v1763_v11 }
  0xee   :  { %v610_v3 = vpop.f32.mrf.mxu0  ;;  %vm646_vm9 = vmor %vm644_vm8, %vm645_vm7 }
  0xef   :  { %v641_v49 = vsub.f32 1.0, %v640_v21  ;;  %v611_v54 = vadd.f32 %v610_v3, %v2224_v41 }
  0xf1   :  { %v642_v63 = vmul.f32 %v1763_v11, %v641_v49  ;;  %v654_v47 = vmul.f32 %v632_v51, %v611_v54 }
  0xf3   :  { %v643_v9 = vadd.f32 %v1763_v11, %v642_v63  ;;  %v655_v21 = vadd.f32 %v654_v47, %v445_v6  ;;  %v342_v63 = vpop.f32.mrf.mxu2 }
  0xf4   :  { %v361_v54 = vpack.c.bf16 %v342_v63, %v342_v63 }
  0xf5   :  { %v647_v28 = vsel %vm646_vm9, %v1763_v11, %v643_v9  ;;  %1764 = vtanh.f32 %v655_v21 }
  0xf6   :  { %v612_v49 = vpop.f32.mrf.mxu0  ;;  %v652_v43 = vsel %vm649_vm10, %v651_v30, %v647_v28  ;;  %377 = vst [vmem:[#allocation2 + $0x44] sm:$0xf] %v361_v54 }
  0xf7   :  { %v657_v61 = vsub.f32 1.0, %v652_v43  ;;  %v659_v5 = vmul.f32 0.0, %v652_v43 }
  0xfb   :  { %v1765_v29 = vpop.eup %1764  ;;  %v345_v51 = vpop.f32.mrf.mxu2 }
  0xfc   :  { %v658_v3 = vmul.f32 %v1765_v29, %v657_v61  ;;  %v363_v9 = vpack.c.bf16 %v345_v51, %v345_v51 }
  0xfe   :  { %v660_v59 = vadd.f32 %v659_v5, %v658_v3  ;;  %379 = vst [vmem:[#allocation2 + $0x50] sm:$0xf] %v363_v9 }
 0x100   :  { %v2228_v6 = vsel %vm667_vm11, %v660_v59, 0.0  ;;  %v1733_v11 = vpack.c.bf16 %v660_v59, %v660_v59 }
 0x101   :  { %669 = vst [vmem:[#allocation10] sm:$0xff] %v2228_v6 }
 0x102   :  { %1734 = vmatmul.msk.bf16.vlgmr.msrb.gmra.mxu1 %vm1732_vm12, %v1733_v11  ;;  %1737 = vmatmul.msk.bf16.vlgmr.msrb.gmra.mxu2 %vm1732_vm12, %v1733_v11 }
 0x103   :  { %1740 = vmatmul.msk.bf16.vlgmr.msra.gmra.mxu3 %vm1732_vm12, %v1733_v11  ;;  %923 = vmatpush.bf16.msrb.mxu1 %v2021_v25  ;;  %v347_v47 = vpop.f32.mrf.mxu2 }
 0x104   :  { %1005 = vmatpush.bf16.msrb.mxu2 %v1994_v8  ;;  %1018 = vmatpush.bf16.msra.mxu3 %v2019_v24  ;;  %v365_v12 = vpack.c.bf16 %v347_v47, %v347_v47 }
 0x106   :  { %381 = vst [vmem:[#allocation2 + $0x5c] sm:$0xf] %v365_v12 }
 0x107   :  { %924 = vmatpush.bf16.msrb.mxu1 %v2028_v37 }
 0x108   :  { %1006 = vmatpush.bf16.msrb.mxu2 %v1997_v17  ;;  %1019 = vmatpush.bf16.msra.mxu3 %v2026_v34 }
 0x10b   :  { %925 = vmatpush.bf16.msrb.mxu1 %v2038_v48 }
 0x10c   :  { %1007 = vmatpush.bf16.msrb.mxu2 %v2000_v26  ;;  %1020 = vmatpush.bf16.msra.mxu3 %v2035_v46 }
 0x10f   :  { %926 = vmatpush.bf16.msrb.mxu1 %v2045_v58 }
 0x110   :  { %1008 = vmatpush.bf16.msrb.mxu2 %v2003_v35  ;;  %1021 = vmatpush.bf16.msra.mxu3 %v2042_v55 }
 0x113   :  { %927 = vmatpush.bf16.msrb.mxu1 %v2054_v4 }
 0x114   :  { %1009 = vmatpush.bf16.msrb.mxu2 %v2006_v44  ;;  %1022 = vmatpush.bf16.msra.mxu3 %v2051_v2 }
 0x117   :  { %928 = vmatpush.bf16.msrb.mxu1 %v2061_v14 }
 0x118   :  { %1010 = vmatpush.bf16.msrb.mxu2 %v2009_v57  ;;  %1023 = vmatpush.bf16.msra.mxu3 %v2058_v13 }
 0x11b   :  { %929 = vmatpush.bf16.msrb.mxu1 %v2070_v27 }
 0x11c   :  { %1011 = vmatpush.bf16.msrb.mxu2 %v2012_v7  ;;  %1024 = vmatpush.bf16.msra.mxu3 %v2067_v20 }
 0x11f   :  { %930 = vmatpush.bf16.msrb.mxu1 %v2079_v32 }
 0x120   :  { %1012 = vmatpush.bf16.msrb.mxu2 %v2015_v22  ;;  %1025 = vmatpush.bf16.msra.mxu3 %v2076_v31 }
 0x17f   :  { %v690_v15 = vpop.f32.mrf.mxu1 }
 0x180   :  { %v691_v21 = vadd.f32 %v690_v15, %v2168_v53 }
 0x182   :  { %v720_v52 = vadd.f32 %v691_v21, %v2178_v0  ;;  %v878_v0 = vsel %vm1664_vm13, 1, %v1946_v36  ;;  %v986_v21 = vsel %vm1667_vm14, 1, %v1946_v36 }
 0x183   :  { %880 = vperm.xlu1 %1754, %v878_v0  }
 0x184   :  { %v1659_v28 = vmul.f32 -1.442695, %v720_v52 }
 0x185   :  { %v703_v16 = vpop.f32.mrf.mxu2 }
 0x186   :  { %1766 = vpow2.f32 %v1659_v28  ;;  %v704_v30 = vadd.f32 %v703_v16, %v2197_v50  ;;  %v716_v49 = vpop.f32.mrf.mxu3 }
 0x187   :  { %v692_v43 = vpop.f32.mrf.mxu1 }
 0x188   :  { %v740_v61 = vadd.f32 %v704_v30, %v2181_v1  ;;  %v673_v1 = vld [vmem:[#allocation2 + $0x14] sm:$0xf] }
 0x189   :  { %v676_v28 = vunpack.c.l.bf16 %v673_v1 }
 0x18a   :  { %v1660_v29 = vmul.f32 -1.442695, %v740_v61 }
 0x18b   :  { %988 = vperm.xlu1 %1754, %v986_v21  }
 0x18c   :  { %v1767_v62 = vpop.eup %1766  ;;  %1768 = vpow2.f32 %v1660_v29  ;;  %v717_v29 = vadd.f32 %v716_v49, %v2224_v41 }
 0x18d   :  { %v724_v63 = vadd.f32 1.0, %v1767_v62  ;;  %v705_v3 = vpop.f32.mrf.mxu2 }
 0x18e   :  { %v718_v5 = vpop.f32.mrf.mxu3  ;;  %v679_v3 = vadd.f32 %v676_v28, %v2221_v33 }
 0x18f   :  { %1770 = vrcp.f32 %v724_v63  ;;  %v736_v47 = vand.u32 2147483648, %v724_v63  ;;  %v734_v15 = vand.u32 2147483647, %v724_v63  ;;  %vm730_vm0 = vweird.f32 %v724_v63 }
 0x191   :  { %v737_v43 = vor.u32 1.1754944e-38, %v736_v47  ;;  %vm735_vm2 = vcmp.eq.f32.partialorder %v734_v15, 8.507059e+37  ;;  %v1418_v47 = vsel %vm1679_vm3, 1, %v1946_v36  ;;  %vm1673_vm3 = vcmp.gt.s32.totalorder %v2094_v23, 5 }
 0x192   :  { %v1769_v54 = vpop.eup %1768 }
 0x193   :  { %v744_v59 = vadd.f32 1.0, %v1769_v54  ;;  %1420 = vperm.xlu1 %1754, %v1418_v47  }
 0x195   :  { %v1771_v11 = vpop.eup %1770  ;;  %1772 = vrcp.f32 %v744_v59  ;;  %v756_v0 = vand.u32 2147483648, %v744_v59  ;;  %v754_v1 = vand.u32 2147483647, %v744_v59  ;;  %vm750_vm5 = vweird.f32 %v744_v59 }
 0x196   :  { %v726_v51 = vmul.f32 %v1771_v11, %v724_v63  ;;  %vm731_vm15 = vweird.f32 %v1771_v11 }
 0x197   :  { %vm732_vm1 = vmor %vm730_vm0, %vm731_vm15  ;;  %vm755_vm7 = vcmp.eq.f32.partialorder %v754_v1, 8.507059e+37 }
 0x198   :  { %v727_v9 = vsub.f32 1.0, %v726_v51 }
 0x19a   :  { %v728_v12 = vmul.f32 %v1771_v11, %v727_v9 }
 0x19b   :  { %v1773_v52 = vpop.eup %1772 }
 0x19c   :  { %v746_v16 = vmul.f32 %v1773_v52, %v744_v59  ;;  %v729_v30 = vadd.f32 %v1771_v11, %v728_v12  ;;  %vm751_vm4 = vweird.f32 %v1773_v52  ;;  %v757_v12 = vor.u32 1.1754944e-38, %v756_v0 }
 0x19d   :  { %vm752_vm6 = vmor %vm750_vm5, %vm751_vm4 }
 0x19e   :  { %v747_v61 = vsub.f32 1.0, %v746_v16  ;;  %v733_v62 = vsel %vm732_vm1, %v1771_v11, %v729_v30  ;;  %v773_v30 = vpop.permute.xlu0 %772 }
 0x19f   :  { %v738_v5 = vsel %vm735_vm2, %v737_v43, %v733_v62  ;;  %vm774_vm8 = vcmp.eq.s32.totalorder %v773_v30, 1  ;;  %vm1670_vm2 = vcmp.gt.s32.totalorder %v2094_v23, 4 }
 0x1a0   :  { %v748_v54 = vmul.f32 %v1773_v52, %v747_v61  ;;  %v760_v51 = vmul.f32 %v738_v5, %v717_v29 }
 0x1a2   :  { %v749_v63 = vadd.f32 %v1773_v52, %v748_v54  ;;  %v761_v9 = vadd.f32 %v760_v51, %v679_v3 }
 0x1a4   :  { %v753_v49 = vsel %vm752_vm6, %v1773_v52, %v749_v63  ;;  %1774 = vtanh.f32 %v761_v9 }
 0x1a5   :  { %v758_v11 = vsel %vm755_vm7, %v757_v12, %v753_v49 }
 0x1a6   :  { %v763_v15 = vsub.f32 1.0, %v758_v11  ;;  %v765_v16 = vmul.f32 %v758_v11, %v2228_v6 }
 0x1aa   :  { %v1775_v21 = vpop.eup %1774 }
 0x1ab   :  { %v764_v28 = vmul.f32 %v1775_v21, %v763_v15 }
 0x1ad   :  { %v766_v43 = vadd.f32 %v765_v16, %v764_v28 }
 0x1af   :  { %v775_v59 = vsel %vm774_vm8, %v766_v43, 0.0  ;;  %v2269_v61 = vsel %vm774_vm8, %v766_v43, %v2228_v6 }
 0x1b0   :  { %777 = vst [vmem:[#allocation10 + $0x8] sm:$0xff] %v775_v59  ;;  %v788_v52 = vpack.c.bf16 %v2269_v61, %v2269_v61 }
 0x1b2   :  { %797 = vmatmul.bf16.vlgmr.msra.gmra.mxu0 %v788_v52  ;;  %810 = vmatmul.bf16.vlgmr.msra.gmra.mxu1 %v788_v52 }
 0x1b3   :  { %823 = vmatmul.bf16.vlgmr.msra.gmra.mxu2 %v788_v52  ;;  %1031 = vmatpush.bf16.msra.mxu0 %v2021_v25 }
 0x1b4   :  { %1113 = vmatpush.bf16.msra.mxu1 %v1994_v8  ;;  %1126 = vmatpush.bf16.msra.mxu2 %v2019_v24 }
 0x1b7   :  { %1032 = vmatpush.bf16.msra.mxu0 %v2028_v37 }
 0x1b8   :  { %1114 = vmatpush.bf16.msra.mxu1 %v1997_v17  ;;  %1127 = vmatpush.bf16.msra.mxu2 %v2026_v34 }
 0x1bb   :  { %1033 = vmatpush.bf16.msra.mxu0 %v2038_v48 }
 0x1bc   :  { %1115 = vmatpush.bf16.msra.mxu1 %v2000_v26  ;;  %1128 = vmatpush.bf16.msra.mxu2 %v2035_v46 }
 0x1bf   :  { %1034 = vmatpush.bf16.msra.mxu0 %v2045_v58 }
 0x1c0   :  { %1116 = vmatpush.bf16.msra.mxu1 %v2003_v35  ;;  %1129 = vmatpush.bf16.msra.mxu2 %v2042_v55 }
 0x1c3   :  { %1035 = vmatpush.bf16.msra.mxu0 %v2054_v4 }
 0x1c4   :  { %1117 = vmatpush.bf16.msra.mxu1 %v2006_v44  ;;  %1130 = vmatpush.bf16.msra.mxu2 %v2051_v2 }
 0x1c7   :  { %1036 = vmatpush.bf16.msra.mxu0 %v2061_v14 }
 0x1c8   :  { %1118 = vmatpush.bf16.msra.mxu1 %v2009_v57  ;;  %1131 = vmatpush.bf16.msra.mxu2 %v2058_v13 }
 0x1cb   :  { %1037 = vmatpush.bf16.msra.mxu0 %v2070_v27 }
 0x1cc   :  { %1119 = vmatpush.bf16.msra.mxu1 %v2012_v7  ;;  %1132 = vmatpush.bf16.msra.mxu2 %v2067_v20 }
 0x1cf   :  { %1038 = vmatpush.bf16.msra.mxu0 %v2079_v32 }
 0x1d0   :  { %1120 = vmatpush.bf16.msra.mxu1 %v2015_v22  ;;  %1133 = vmatpush.bf16.msra.mxu2 %v2076_v31 }
 0x22f   :  { %v798_v6 = vpop.f32.mrf.mxu0  ;;  %v811_v29 = vpop.f32.mrf.mxu1 }
 0x230   :  { %v799_v62 = vadd.f32 %v798_v6, %v2168_v53  ;;  %v812_v3 = vadd.f32 %v811_v29, %v2197_v50 }
 0x232   :  { %v828_v5 = vadd.f32 %v799_v62, %v2185_v18  ;;  %v848_v54 = vadd.f32 %v812_v3, %v2188_v19  ;;  %v781_v19 = vld [vmem:[#allocation2 + $0x20] sm:$0xf] }
 0x233   :  { %v784_v62 = vunpack.c.l.bf16 %v781_v19 }
 0x234   :  { %v1662_v0 = vmul.f32 -1.442695, %v828_v5  ;;  %v1663_v51 = vmul.f32 -1.442695, %v848_v54 }
 0x236   :  { %1776 = vpow2.f32 %v1662_v0  ;;  %v824_v1 = vpop.f32.mrf.mxu2 }
 0x237   :  { %1778 = vpow2.f32 %v1663_v51  ;;  %v800_v63 = vpop.f32.mrf.mxu0  ;;  %v813_v9 = vpop.f32.mrf.mxu1  ;;  %v825_v54 = vadd.f32 %v824_v1, %v2224_v41 }
 0x238   :  { %v787_v9 = vadd.f32 %v784_v62, %v2221_v33 }
 0x23c   :  { %v1777_v47 = vpop.eup %1776 }
 0x23d   :  { %v1779_v12 = vpop.eup %1778  ;;  %v832_v49 = vadd.f32 1.0, %v1777_v47 }
 0x23e   :  { %v852_v11 = vadd.f32 1.0, %v1779_v12  ;;  %v826_v15 = vpop.f32.mrf.mxu2 }
 0x23f   :  { %1780 = vrcp.f32 %v832_v49  ;;  %v844_v43 = vand.u32 2147483648, %v832_v49  ;;  %v842_v6 = vand.u32 2147483647, %v832_v49  ;;  %vm838_vm10 = vweird.f32 %v832_v49 }
 0x240   :  { %1782 = vrcp.f32 %v852_v11  ;;  %v864_v12 = vand.u32 2147483648, %v852_v11  ;;  %vm858_vm14 = vweird.f32 %v852_v11  ;;  %v862_v15 = vand.u32 2147483647, %v852_v11 }
 0x241   :  { %v845_v5 = vor.u32 1.1754944e-38, %v844_v43  ;;  %vm843_vm12 = vcmp.eq.f32.partialorder %v842_v6, 8.507059e+37 }
 0x242   :  { %vm863_vm0 = vcmp.eq.f32.partialorder %v862_v15, 8.507059e+37 }
 0x245   :  { %v1781_v21 = vpop.eup %1780 }
 0x246   :  { %v1783_v28 = vpop.eup %1782  ;;  %v834_v16 = vmul.f32 %v1781_v21, %v832_v49  ;;  %vm839_vm9 = vweird.f32 %v1781_v21  ;;  %v865_v49 = vor.u32 1.1754944e-38, %v864_v12 }
 0x247   :  { %v854_v18 = vmul.f32 %v1783_v28, %v852_v11  ;;  %vm840_vm11 = vmor %vm838_vm10, %vm839_vm9  ;;  %vm859_vm13 = vweird.f32 %v1783_v28 }
 0x248   :  { %v835_v30 = vsub.f32 1.0, %v834_v16  ;;  %vm860_vm15 = vmor %vm858_vm14, %vm859_vm13 }
 0x249   :  { %v855_v59 = vsub.f32 1.0, %v854_v18 }
 0x24a   :  { %v836_v52 = vmul.f32 %v1781_v21, %v835_v30 }
 0x24b   :  { %v856_v29 = vmul.f32 %v1783_v28, %v855_v59 }
 0x24c   :  { %v837_v3 = vadd.f32 %v1781_v21, %v836_v52 }
 0x24d   :  { %v857_v63 = vadd.f32 %v1783_v28, %v856_v29 }
 0x24e   :  { %v841_v0 = vsel %vm840_vm11, %v1781_v21, %v837_v3  ;;  %v881_v21 = vpop.permute.xlu1 %880 }
 0x24f   :  { %v846_v51 = vsel %vm843_vm12, %v845_v5, %v841_v0  ;;  %v861_v18 = vsel %vm860_vm15, %v1783_v28, %v857_v63  ;;  %vm882_vm1 = vcmp.eq.s32.totalorder %v881_v21, 1 }
 0x250   :  { %v868_v47 = vmul.f32 %v846_v51, %v825_v54  ;;  %v866_v30 = vsel %vm863_vm0, %v865_v49, %v861_v18 }
 0x251   :  { %v871_v19 = vsub.f32 1.0, %v866_v30  ;;  %v873_v59 = vmul.f32 %v866_v30, %v2269_v61 }
 0x252   :  { %v869_v16 = vadd.f32 %v868_v47, %v787_v9 }
 0x254   :  { %1784 = vtanh.f32 %v869_v16 }
 0x25a   :  { %v1785_v1 = vpop.eup %1784 }
 0x25b   :  { %v872_v43 = vmul.f32 %v1785_v1, %v871_v19  ;;  %v1094_v19 = vsel %vm1670_vm2, 1, %v1946_v36 }
 0x25c   :  { %1096 = vperm.xlu2 %1755, %v1094_v19  }
 0x25d   :  { %v874_v52 = vadd.f32 %v873_v59, %v872_v43  ;;  %v889_v59 = vld [vmem:[#allocation2 + $0x2c] sm:$0xf] }
 0x25f   :  { %v883_v6 = vsel %vm882_vm1, %v874_v52, 0.0  ;;  %v2305_v29 = vsel %vm882_vm1, %v874_v52, %v2269_v61 }
 0x260   :  { %885 = vst [vmem:[#allocation10 + $0x10] sm:$0xff] %v883_v6  ;;  %v896_v11 = vpack.c.bf16 %v2305_v29, %v2305_v29 }
 0x262   :  { %905 = vmatmul.bf16.vlgmr.msrb.gmra.mxu3 %v896_v11  ;;  %918 = vmatmul.bf16.vlgmr.msrb.gmra.mxu0 %v896_v11 }
 0x263   :  { %931 = vmatmul.bf16.vlgmr.msrb.gmra.mxu1 %v896_v11  ;;  %1139 = vmatpush.bf16.msrb.mxu3 %v2021_v25 }
 0x264   :  { %1221 = vmatpush.bf16.msrb.mxu0 %v1994_v8  ;;  %1234 = vmatpush.bf16.msrb.mxu1 %v2019_v24 }
 0x267   :  { %1140 = vmatpush.bf16.msrb.mxu3 %v2028_v37 }
 0x268   :  { %1222 = vmatpush.bf16.msrb.mxu0 %v1997_v17  ;;  %1235 = vmatpush.bf16.msrb.mxu1 %v2026_v34 }
 0x26b   :  { %1141 = vmatpush.bf16.msrb.mxu3 %v2038_v48 }
 0x26c   :  { %1223 = vmatpush.bf16.msrb.mxu0 %v2000_v26  ;;  %1236 = vmatpush.bf16.msrb.mxu1 %v2035_v46 }
 0x26f   :  { %1142 = vmatpush.bf16.msrb.mxu3 %v2045_v58 }
 0x270   :  { %1224 = vmatpush.bf16.msrb.mxu0 %v2003_v35  ;;  %1237 = vmatpush.bf16.msrb.mxu1 %v2042_v55 }
 0x273   :  { %1143 = vmatpush.bf16.msrb.mxu3 %v2054_v4 }
 0x274   :  { %1225 = vmatpush.bf16.msrb.mxu0 %v2006_v44  ;;  %1238 = vmatpush.bf16.msrb.mxu1 %v2051_v2 }
 0x277   :  { %1144 = vmatpush.bf16.msrb.mxu3 %v2061_v14 }
 0x278   :  { %1226 = vmatpush.bf16.msrb.mxu0 %v2009_v57  ;;  %1239 = vmatpush.bf16.msrb.mxu1 %v2058_v13 }
 0x27b   :  { %1145 = vmatpush.bf16.msrb.mxu3 %v2070_v27 }
 0x27c   :  { %1227 = vmatpush.bf16.msrb.mxu0 %v2012_v7  ;;  %1240 = vmatpush.bf16.msrb.mxu1 %v2067_v20 }
 0x27f   :  { %1146 = vmatpush.bf16.msrb.mxu3 %v2079_v32 }
 0x280   :  { %1228 = vmatpush.bf16.msrb.mxu0 %v2015_v22  ;;  %1241 = vmatpush.bf16.msrb.mxu1 %v2076_v31 }
 0x2df   :  { %v919_v61 = vpop.f32.mrf.mxu0 }
 0x2e0   :  { %v920_v28 = vadd.f32 %v919_v61, %v2197_v50  ;;  %v932_v62 = vpop.f32.mrf.mxu1  ;;  %v1202_v61 = vsel %vm1673_vm3, 1, %v1946_v36 }
 0x2e1   :  { %1204 = vperm.xlu2 %1755, %v1202_v61  }
 0x2e2   :  { %v956_v3 = vadd.f32 %v920_v28, %v2191_v40 }
 0x2e4   :  { %v1666_v5 = vmul.f32 -1.442695, %v956_v3  ;;  %v892_v3 = vunpack.c.l.bf16 %v889_v59 }
 0x2e5   :  { %v906_v54 = vpop.f32.mrf.mxu3 }
 0x2e6   :  { %1786 = vpow2.f32 %v1666_v5  ;;  %v907_v0 = vadd.f32 %v906_v54, %v2168_v53 }
 0x2e7   :  { %v921_v51 = vpop.f32.mrf.mxu0 }
 0x2e8   :  { %v936_v63 = vadd.f32 %v907_v0, %v2194_v42  ;;  %v934_v9 = vpop.f32.mrf.mxu1  ;;  %v933_v0 = vadd.f32 %v932_v62, %v2224_v41 }
 0x2ea   :  { %v1665_v47 = vmul.f32 -1.442695, %v936_v63 }
 0x2ec   :  { %v1787_v12 = vpop.eup %1786  ;;  %1788 = vpow2.f32 %v1665_v47  ;;  %v895_v47 = vadd.f32 %v892_v3, %v2221_v33 }
 0x2ed   :  { %v960_v15 = vadd.f32 1.0, %v1787_v12  ;;  %v908_v16 = vpop.f32.mrf.mxu3 }
 0x2ef   :  { %1790 = vrcp.f32 %v960_v15  ;;  %v972_v9 = vand.u32 2147483648, %v960_v15  ;;  %vm966_vm9 = vweird.f32 %v960_v15  ;;  %v970_v36 = vand.u32 2147483647, %v960_v15 }
 0x2f1   :  { %vm971_vm11 = vcmp.eq.f32.partialorder %v970_v36, 8.507059e+37 }
 0x2f2   :  { %v1789_v18 = vpop.eup %1788 }
 0x2f3   :  { %v940_v49 = vadd.f32 1.0, %v1789_v18 }
 0x2f5   :  { %1792 = vrcp.f32 %v940_v49  ;;  %v1791_v30 = vpop.eup %1790  ;;  %v952_v52 = vand.u32 2147483648, %v940_v49  ;;  %v950_v11 = vand.u32 2147483647, %v940_v49  ;;  %vm946_vm5 = vweird.f32 %v940_v49 }
 0x2f6   :  { %v962_v40 = vmul.f32 %v1791_v30, %v960_v15  ;;  %vm967_vm8 = vweird.f32 %v1791_v30 }
 0x2f7   :  { %v953_v54 = vor.u32 1.1754944e-38, %v952_v52  ;;  %vm951_vm7 = vcmp.eq.f32.partialorder %v950_v11, 8.507059e+37  ;;  %vm968_vm10 = vmor %vm966_vm9, %vm967_vm8 }
 0x2f8   :  { %v963_v42 = vsub.f32 1.0, %v962_v40 }
 0x2fa   :  { %v964_v28 = vmul.f32 %v1791_v30, %v963_v42  ;;  %v989_v42 = vpop.permute.xlu1 %988 }
 0x2fb   :  { %v1793_v1 = vpop.eup %1792  ;;  %vm990_vm12 = vcmp.eq.s32.totalorder %v989_v42, 1 }
 0x2fc   :  { %v942_v21 = vmul.f32 %v1793_v1, %v940_v49  ;;  %vm947_vm4 = vweird.f32 %v1793_v1  ;;  %v965_v23 = vadd.f32 %v1791_v30, %v964_v28  ;;  %v973_v49 = vor.u32 1.1754944e-38, %v972_v9 }
 0x2fd   :  { %vm948_vm6 = vmor %vm946_vm5, %vm947_vm4 }
 0x2fe   :  { %v943_v43 = vsub.f32 1.0, %v942_v21  ;;  %v969_v18 = vsel %vm968_vm10, %v1791_v30, %v965_v23 }
 0x2ff   :  { %v974_v40 = vsel %vm971_vm11, %v973_v49, %v969_v18 }
 0x300   :  { %v944_v6 = vmul.f32 %v1793_v1, %v943_v43  ;;  %v979_v19 = vsub.f32 1.0, %v974_v40  ;;  %v981_v21 = vmul.f32 %v974_v40, %v2305_v29 }
 0x302   :  { %v945_v5 = vadd.f32 %v1793_v1, %v944_v6 }
 0x304   :  { %v949_v51 = vsel %vm948_vm6, %v1793_v1, %v945_v5 }
 0x305   :  { %v954_v63 = vsel %vm951_vm7, %v953_v54, %v949_v51 }
 0x306   :  { %v976_v12 = vmul.f32 %v954_v63, %v933_v0 }
 0x308   :  { %v977_v16 = vadd.f32 %v976_v12, %v895_v47 }
 0x30a   :  { %1794 = vtanh.f32 %v977_v16 }
 0x310   :  { %v1795_v62 = vpop.eup %1794 }
 0x311   :  { %v980_v1 = vmul.f32 %v1795_v62, %v979_v19 }
 0x313   :  { %v982_v43 = vadd.f32 %v981_v21, %v980_v1 }
 0x315   :  { %v991_v59 = vsel %vm990_vm12, %v982_v43, 0.0  ;;  %v2345_v52 = vsel %vm990_vm12, %v982_v43, %v2305_v29  ;;  %v1097_v43 = vpop.permute.xlu2 %1096 }
 0x316   :  { %993 = vst [vmem:[#allocation10 + $0x18] sm:$0xff] %v991_v59  ;;  %v1004_v15 = vpack.c.bf16 %v2345_v52, %v2345_v52  ;;  %vm1098_vm5 = vcmp.eq.s32.totalorder %v1097_v43, 1  ;;  %v1212_v43 = vld [vmem:[#allocation2 + $0x48] sm:$0xff] }
 0x318   :  { %1013 = vmatmul.bf16.vlgmr.msrb.gmra.mxu2 %v1004_v15  ;;  %1026 = vmatmul.bf16.vlgmr.msra.gmra.mxu3 %v1004_v15 }
 0x319   :  { %1039 = vmatmul.bf16.vlgmr.msra.gmra.mxu0 %v1004_v15  ;;  %1247 = vmatpush.bf16.msrb.mxu2 %v2021_v25 }
 0x31a   :  { %1329 = vmatpush.bf16.msra.mxu3 %v1994_v8  ;;  %1342 = vmatpush.bf16.msra.mxu0 %v2019_v24 }
 0x31d   :  { %1248 = vmatpush.bf16.msrb.mxu2 %v2028_v37 }
 0x31e   :  { %1330 = vmatpush.bf16.msra.mxu3 %v1997_v17  ;;  %1343 = vmatpush.bf16.msra.mxu0 %v2026_v34 }
 0x321   :  { %1249 = vmatpush.bf16.msrb.mxu2 %v2038_v48 }
 0x322   :  { %1331 = vmatpush.bf16.msra.mxu3 %v2000_v26  ;;  %1344 = vmatpush.bf16.msra.mxu0 %v2035_v46 }
 0x325   :  { %1250 = vmatpush.bf16.msrb.mxu2 %v2045_v58 }
 0x326   :  { %1332 = vmatpush.bf16.msra.mxu3 %v2003_v35  ;;  %1345 = vmatpush.bf16.msra.mxu0 %v2042_v55 }
 0x329   :  { %1251 = vmatpush.bf16.msrb.mxu2 %v2054_v4 }
 0x32a   :  { %1333 = vmatpush.bf16.msra.mxu3 %v2006_v44  ;;  %1346 = vmatpush.bf16.msra.mxu0 %v2051_v2 }
 0x32d   :  { %1252 = vmatpush.bf16.msrb.mxu2 %v2061_v14 }
 0x32e   :  { %1334 = vmatpush.bf16.msra.mxu3 %v2009_v57  ;;  %1347 = vmatpush.bf16.msra.mxu0 %v2058_v13 }
 0x331   :  { %1253 = vmatpush.bf16.msrb.mxu2 %v2070_v27 }
 0x332   :  { %1335 = vmatpush.bf16.msra.mxu3 %v2012_v7  ;;  %1348 = vmatpush.bf16.msra.mxu0 %v2067_v20 }
 0x335   :  { %1254 = vmatpush.bf16.msrb.mxu2 %v2079_v32 }
 0x336   :  { %1336 = vmatpush.bf16.msra.mxu3 %v2015_v22  ;;  %1349 = vmatpush.bf16.msra.mxu0 %v2076_v31 }
 0x396   :  { %v1040_v8 = vpop.f32.mrf.mxu0 }
 0x397   :  { %v1041_v63 = vadd.f32 %v1040_v8, %v2224_v41 }
 0x39b   :  { %v1014_v17 = vpop.f32.mrf.mxu2  ;;  %v1027_v26 = vpop.f32.mrf.mxu3 }
 0x39c   :  { %v1015_v35 = vadd.f32 %v1014_v17, %v2168_v53  ;;  %v1028_v44 = vadd.f32 %v1027_v26, %v2197_v50 }
 0x39e   :  { %v1044_v57 = vadd.f32 %v1015_v35, %v2205_v10  ;;  %v1064_v24 = vadd.f32 %v1028_v44, %v2208_v45  ;;  %v1042_v7 = vpop.f32.mrf.mxu0  ;;  %v997_v45 = vld [vmem:[#allocation2 + $0x38] sm:$0xf] }
 0x39f   :  { %v1000_v51 = vunpack.c.l.bf16 %v997_v45 }
 0x3a0   :  { %v1668_v34 = vmul.f32 -1.442695, %v1044_v57  ;;  %v1669_v46 = vmul.f32 -1.442695, %v1064_v24 }
 0x3a1   :  { %v1003_v36 = vadd.f32 %v1000_v51, %v2221_v33 }
 0x3a2   :  { %1796 = vpow2.f32 %v1668_v34 }
 0x3a3   :  { %1798 = vpow2.f32 %v1669_v46  ;;  %v1016_v55 = vpop.f32.mrf.mxu2  ;;  %v1029_v22 = vpop.f32.mrf.mxu3 }
 0x3a8   :  { %v1797_v2 = vpop.eup %1796 }
 0x3a9   :  { %v1799_v13 = vpop.eup %1798  ;;  %v1048_v20 = vadd.f32 1.0, %v1797_v2  ;;  %v1105_v2 = vld [vmem:[#allocation2 + $0x44] sm:$0xf] }
 0x3aa   :  { %v1068_v31 = vadd.f32 1.0, %v1799_v13 }
 0x3ab   :  { %1800 = vrcp.f32 %v1048_v20  ;;  %v1060_v61 = vand.u32 2147483648, %v1048_v20  ;;  %v1058_v5 = vand.u32 2147483647, %v1048_v20  ;;  %vm1054_vm14 = vweird.f32 %v1048_v20 }
 0x3ac   :  { %1802 = vrcp.f32 %v1068_v31  ;;  %v1080_v16 = vand.u32 2147483648, %v1068_v31  ;;  %vm1074_vm2 = vweird.f32 %v1068_v31  ;;  %v1078_v49 = vand.u32 2147483647, %v1068_v31 }
 0x3ad   :  { %v1061_v23 = vor.u32 1.1754944e-38, %v1060_v61  ;;  %vm1059_vm0 = vcmp.eq.f32.partialorder %v1058_v5, 8.507059e+37 }
 0x3ae   :  { %v1081_v62 = vor.u32 1.1754944e-38, %v1080_v16  ;;  %vm1079_vm4 = vcmp.eq.f32.partialorder %v1078_v49, 8.507059e+37  ;;  %v1205_v49 = vpop.permute.xlu2 %1204 }
 0x3b1   :  { %v1801_v29 = vpop.eup %1800 }
 0x3b2   :  { %v1803_v30 = vpop.eup %1802  ;;  %v1050_v6 = vmul.f32 %v1801_v29, %v1048_v20  ;;  %vm1055_vm13 = vweird.f32 %v1801_v29 }
 0x3b3   :  { %v1070_v11 = vmul.f32 %v1803_v30, %v1068_v31  ;;  %vm1056_vm15 = vmor %vm1054_vm14, %vm1055_vm13  ;;  %vm1075_vm1 = vweird.f32 %v1803_v30  ;;  %vm1206_vm14 = vcmp.eq.s32.totalorder %v1205_v49, 1 }
 0x3b4   :  { %v1051_v10 = vsub.f32 1.0, %v1050_v6  ;;  %vm1076_vm3 = vmor %vm1074_vm2, %vm1075_vm1 }
 0x3b5   :  { %v1071_v28 = vsub.f32 1.0, %v1070_v11 }
 0x3b6   :  { %v1052_v3 = vmul.f32 %v1801_v29, %v1051_v10 }
 0x3b7   :  { %v1072_v54 = vmul.f32 %v1803_v30, %v1071_v28 }
 0x3b8   :  { %v1053_v0 = vadd.f32 %v1801_v29, %v1052_v3 }
 0x3b9   :  { %v1073_v12 = vadd.f32 %v1803_v30, %v1072_v54 }
 0x3ba   :  { %v1057_v9 = vsel %vm1056_vm15, %v1801_v29, %v1053_v0 }
 0x3bb   :  { %v1062_v47 = vsel %vm1059_vm0, %v1061_v23, %v1057_v9  ;;  %v1077_v19 = vsel %vm1076_vm3, %v1803_v30, %v1073_v12 }
 0x3bc   :  { %v1084_v18 = vmul.f32 %v1062_v47, %v1041_v63  ;;  %v1082_v1 = vsel %vm1079_vm4, %v1081_v62, %v1077_v19 }
 0x3bd   :  { %v1087_v21 = vsub.f32 1.0, %v1082_v1  ;;  %v1089_v15 = vmul.f32 %v1082_v1, %v2345_v52 }
 0x3be   :  { %v1085_v40 = vadd.f32 %v1084_v18, %v1003_v36 }
 0x3c0   :  { %1804 = vtanh.f32 %v1085_v40 }
 0x3c6   :  { %v1805_v42 = vpop.eup %1804 }
 0x3c7   :  { %v1088_v59 = vmul.f32 %v1805_v42, %v1087_v21 }
 0x3c9   :  { %v1090_v8 = vadd.f32 %v1089_v15, %v1088_v59  ;;  %v1214_v59 = vunpack.c.l.bf16 %v1212_v43  ;;  %v1215_v15 = vunpack.c.h.bf16 %v1212_v43 }
 0x3cb   :  { %v1099_v17 = vsel %vm1098_vm5, %v1090_v8, 0.0  ;;  %v2381_v26 = vsel %vm1098_vm5, %v1090_v8, %v2345_v52 }
 0x3cc   :  { %1101 = vst [vmem:[#allocation10 + $0x20] sm:$0xff] %v1099_v17  ;;  %v1112_v35 = vpack.c.bf16 %v2381_v26, %v2381_v26 }
 0x3ce   :  { %1121 = vmatmul.bf16.vlgmr.msra.gmra.mxu1 %v1112_v35  ;;  %1134 = vmatmul.bf16.vlgmr.msra.gmra.mxu2 %v1112_v35 }
 0x3cf   :  { %1147 = vmatmul.bf16.vlgmr.msrb.gmra.mxu3 %v1112_v35  ;;  %1355 = vmatpush.bf16.msra.mxu1 %v2021_v25  ;;  %v1217_v35 = vadd.f32 %v1214_v59, %v2171_v56 }
 0x3d3   :  { %1356 = vmatpush.bf16.msra.mxu1 %v2028_v37 }
 0x3d7   :  { %1357 = vmatpush.bf16.msra.mxu1 %v2038_v48 }
 0x3db   :  { %1358 = vmatpush.bf16.msra.mxu1 %v2045_v58 }
 0x3df   :  { %1359 = vmatpush.bf16.msra.mxu1 %v2054_v4 }
 0x3e3   :  { %1360 = vmatpush.bf16.msra.mxu1 %v2061_v14 }
 0x3e7   :  { %1361 = vmatpush.bf16.msra.mxu1 %v2070_v27 }
 0x3eb   :  { %1362 = vmatpush.bf16.msra.mxu1 %v2079_v32 }
 0x44b   :  { %v1122_v52 = vpop.f32.mrf.mxu1 }
 0x44c   :  { %v1123_v44 = vadd.f32 %v1122_v52, %v2168_v53 }
 0x44e   :  { %v1152_v57 = vadd.f32 %v1123_v44, %v2211_v38  ;;  %v1218_v44 = vadd.f32 %v1215_v15, %v2174_v60 }
 0x450   :  { %v1671_v25 = vmul.f32 -1.442695, %v1152_v57 }
 0x451   :  { %v1135_v24 = vpop.f32.mrf.mxu2 }
 0x452   :  { %1806 = vpow2.f32 %v1671_v25  ;;  %v1136_v37 = vadd.f32 %v1135_v24, %v2197_v50  ;;  %v1148_v48 = vpop.f32.mrf.mxu3 }
 0x453   :  { %v1124_v58 = vpop.f32.mrf.mxu1  ;;  %v1149_v45 = vadd.f32 %v1148_v48, %v2224_v41 }
 0x454   :  { %v1172_v4 = vadd.f32 %v1136_v37, %v2214_v39  ;;  %v1108_v39 = vunpack.c.l.bf16 %v1105_v2 }
 0x456   :  { %v1672_v7 = vmul.f32 -1.442695, %v1172_v4  ;;  %v1111_v3 = vadd.f32 %v1108_v39, %v2221_v33 }
 0x458   :  { %v1807_v14 = vpop.eup %1806  ;;  %1808 = vpow2.f32 %v1672_v7 }
 0x459   :  { %v1156_v27 = vadd.f32 1.0, %v1807_v14  ;;  %v1137_v34 = vpop.f32.mrf.mxu2 }
 0x45a   :  { %v1150_v32 = vpop.f32.mrf.mxu3 }
 0x45b   :  { %1810 = vrcp.f32 %v1156_v27  ;;  %v1168_v20 = vand.u32 2147483648, %v1156_v27  ;;  %v1166_v29 = vand.u32 2147483647, %v1156_v27  ;;  %vm1162_vm7 = vweird.f32 %v1156_v27 }
 0x45d   :  { %v1169_v10 = vor.u32 1.1754944e-38, %v1168_v20  ;;  %vm1167_vm9 = vcmp.eq.f32.partialorder %v1166_v29, 8.507059e+37  ;;  %v1213_v20 = vld [vmem:[#allocation2 + $0x50] sm:$0xf] }
 0x45e   :  { %v1809_v46 = vpop.eup %1808 }
 0x45f   :  { %v1176_v55 = vadd.f32 1.0, %v1809_v46 }
 0x461   :  { %v1811_v22 = vpop.eup %1810  ;;  %1812 = vrcp.f32 %v1176_v55  ;;  %v1188_v0 = vand.u32 2147483648, %v1176_v55  ;;  %v1186_v23 = vand.u32 2147483647, %v1176_v55  ;;  %vm1182_vm11 = vweird.f32 %v1176_v55 }
 0x462   :  { %v1158_v38 = vmul.f32 %v1811_v22, %v1156_v27  ;;  %vm1163_vm6 = vweird.f32 %v1811_v22 }
 0x463   :  { %vm1164_vm8 = vmor %vm1162_vm7, %vm1163_vm6  ;;  %v1189_v47 = vor.u32 1.1754944e-38, %v1188_v0  ;;  %vm1187_vm13 = vcmp.eq.f32.partialorder %v1186_v23, 8.507059e+37 }
 0x464   :  { %v1159_v13 = vsub.f32 1.0, %v1158_v38 }
 0x466   :  { %v1160_v31 = vmul.f32 %v1811_v22, %v1159_v13 }
 0x467   :  { %v1813_v30 = vpop.eup %1812 }
 0x468   :  { %v1178_v6 = vmul.f32 %v1813_v30, %v1176_v55  ;;  %v1161_v11 = vadd.f32 %v1811_v22, %v1160_v31  ;;  %vm1183_vm10 = vweird.f32 %v1813_v30 }
 0x469   :  { %vm1184_vm12 = vmor %vm1182_vm11, %vm1183_vm10 }
 0x46a   :  { %v1179_v61 = vsub.f32 1.0, %v1178_v6  ;;  %v1165_v28 = vsel %vm1164_vm8, %v1811_v22, %v1161_v11  ;;  %v1216_v6 = vunpack.c.l.bf16 %v1213_v20 }
 0x46b   :  { %v1170_v5 = vsel %vm1167_vm9, %v1169_v10, %v1165_v28 }
 0x46c   :  { %v1180_v54 = vmul.f32 %v1813_v30, %v1179_v61  ;;  %v1192_v51 = vmul.f32 %v1170_v5, %v1149_v45 }
 0x46e   :  { %v1181_v63 = vadd.f32 %v1813_v30, %v1180_v54  ;;  %v1193_v9 = vadd.f32 %v1192_v51, %v1111_v3  ;;  %v1219_v54 = vadd.f32 %v1216_v6, %v2221_v33 }
 0x470   :  { %v1185_v12 = vsel %vm1184_vm12, %v1813_v30, %v1181_v63  ;;  %1814 = vtanh.f32 %v1193_v9 }
 0x471   :  { %v1190_v36 = vsel %vm1187_vm13, %v1189_v47, %v1185_v12 }
 0x472   :  { %v1195_v16 = vsub.f32 1.0, %v1190_v36  ;;  %v1197_v19 = vmul.f32 %v1190_v36, %v2381_v26 }
 0x476   :  { %v1815_v18 = vpop.eup %1814 }
 0x477   :  { %v1196_v40 = vmul.f32 %v1815_v18, %v1195_v16  ;;  %v1313_v16 = vpop.permute.xlu0 %1312 }
 0x478   :  { %vm1314_vm7 = vcmp.eq.s32.totalorder %v1313_v16, 1 }
 0x479   :  { %v1198_v62 = vadd.f32 %v1197_v19, %v1196_v40 }
 0x47b   :  { %v1207_v1 = vsel %vm1206_vm14, %v1198_v62, 0.0  ;;  %v2401_v21 = vsel %vm1206_vm14, %v1198_v62, %v2381_v26 }
 0x47c   :  { %1209 = vst [vmem:[#allocation10 + $0x28] sm:$0xff] %v1207_v1  ;;  %v1220_v42 = vpack.c.bf16 %v2401_v21, %v2401_v21 }
 0x47e   :  { %1229 = vmatmul.bf16.vlgmr.msrb.gmra.mxu0 %v1220_v42  ;;  %1242 = vmatmul.bf16.vlgmr.msrb.gmra.mxu1 %v1220_v42 }
 0x47f   :  { %1255 = vmatmul.bf16.vlgmr.msrb.gmra.mxu2 %v1220_v42  ;;  %v1320_v42 = vld [vmem:[#allocation2 + $0x54] sm:$0xff] }
 0x480   :  { %v1323_v43 = vunpack.c.h.bf16 %v1320_v42 }
 0x482   :  { %v1326_v15 = vadd.f32 %v1323_v43, %v2174_v60 }
 0x4fb   :  { %v1230_v8 = vpop.f32.mrf.mxu0  ;;  %v1243_v17 = vpop.f32.mrf.mxu1 }
 0x4fc   :  { %v1231_v52 = vadd.f32 %v1230_v8, %v2168_v53  ;;  %v1244_v26 = vadd.f32 %v1243_v17, %v2197_v50 }
 0x4fe   :  { %v1260_v57 = vadd.f32 %v1231_v52, %v1217_v35  ;;  %v1280_v25 = vadd.f32 %v1244_v26, %v1218_v44  ;;  %v1322_v52 = vunpack.c.l.bf16 %v1320_v42 }
 0x500   :  { %v1674_v24 = vmul.f32 -1.442695, %v1260_v57  ;;  %v1675_v37 = vmul.f32 -1.442695, %v1280_v25  ;;  %v1325_v26 = vadd.f32 %v1322_v52, %v2171_v56 }
 0x502   :  { %1816 = vpow2.f32 %v1674_v24  ;;  %v1256_v48 = vpop.f32.mrf.mxu2 }
 0x503   :  { %1818 = vpow2.f32 %v1675_v37  ;;  %v1232_v58 = vpop.f32.mrf.mxu0  ;;  %v1245_v4 = vpop.f32.mrf.mxu1  ;;  %v1257_v61 = vadd.f32 %v1256_v48, %v2224_v41 }
 0x508   :  { %v1817_v7 = vpop.eup %1816 }
 0x509   :  { %v1819_v14 = vpop.eup %1818  ;;  %v1264_v27 = vadd.f32 1.0, %v1817_v7 }
 0x50a   :  { %v1284_v34 = vadd.f32 1.0, %v1819_v14  ;;  %v1258_v32 = vpop.f32.mrf.mxu2 }
 0x50b   :  { %1820 = vrcp.f32 %v1264_v27  ;;  %v1276_v31 = vand.u32 2147483648, %v1264_v27  ;;  %v1274_v30 = vand.u32 2147483647, %v1264_v27  ;;  %vm1270_vm0 = vweird.f32 %v1264_v27 }
 0x50c   :  { %1822 = vrcp.f32 %v1284_v34  ;;  %v1296_v5 = vand.u32 2147483648, %v1284_v34  ;;  %vm1290_vm4 = vweird.f32 %v1284_v34  ;;  %v1294_v51 = vand.u32 2147483647, %v1284_v34 }
 0x50d   :  { %v1277_v10 = vor.u32 1.1754944e-38, %v1276_v31  ;;  %vm1275_vm2 = vcmp.eq.f32.partialorder %v1274_v30, 8.507059e+37 }
 0x50e   :  { %v1297_v9 = vor.u32 1.1754944e-38, %v1296_v5  ;;  %vm1295_vm6 = vcmp.eq.f32.partialorder %v1294_v51, 8.507059e+37  ;;  %v1421_v51 = vpop.permute.xlu1 %1420 }
 0x511   :  { %v1821_v46 = vpop.eup %1820 }
 0x512   :  { %v1823_v55 = vpop.eup %1822  ;;  %v1266_v22 = vmul.f32 %v1821_v46, %v1264_v27  ;;  %vm1271_vm15 = vweird.f32 %v1821_v46 }
 0x513   :  { %v1286_v38 = vmul.f32 %v1823_v55, %v1284_v34  ;;  %vm1272_vm1 = vmor %vm1270_vm0, %vm1271_vm15  ;;  %vm1291_vm3 = vweird.f32 %v1823_v55  ;;  %vm1422_vm0 = vcmp.eq.s32.totalorder %v1421_v51, 1 }
 0x514   :  { %v1267_v2 = vsub.f32 1.0, %v1266_v22  ;;  %vm1292_vm5 = vmor %vm1290_vm4, %vm1291_vm3 }
 0x515   :  { %v1287_v13 = vsub.f32 1.0, %v1286_v38 }
 0x516   :  { %v1268_v29 = vmul.f32 %v1821_v46, %v1267_v2 }
 0x517   :  { %v1288_v39 = vmul.f32 %v1823_v55, %v1287_v13 }
 0x518   :  { %v1269_v11 = vadd.f32 %v1821_v46, %v1268_v29 }
 0x519   :  { %v1289_v3 = vadd.f32 %v1823_v55, %v1288_v39 }
 0x51a   :  { %v1273_v45 = vsel %vm1272_vm1, %v1821_v46, %v1269_v11 }
 0x51b   :  { %v1278_v28 = vsel %vm1275_vm2, %v1277_v10, %v1273_v45  ;;  %v1293_v63 = vsel %vm1292_vm5, %v1823_v55, %v1289_v3  ;;  %v1321_v55 = vld [vmem:[#allocation2 + $0x5c] sm:$0xf] }
 0x51c   :  { %v1300_v0 = vmul.f32 %v1278_v28, %v1257_v61  ;;  %v1298_v47 = vsel %vm1295_vm6, %v1297_v9, %v1293_v63  ;;  %v1324_v13 = vunpack.c.l.bf16 %v1321_v55 }
 0x51d   :  { %v1303_v12 = vsub.f32 1.0, %v1298_v47  ;;  %v1305_v49 = vmul.f32 %v1298_v47, %v2401_v21 }
 0x51e   :  { %v1301_v23 = vadd.f32 %v1300_v0, %v1219_v54  ;;  %v1327_v10 = vadd.f32 %v1324_v13, %v2221_v33 }
 0x520   :  { %1824 = vtanh.f32 %v1301_v23 }
 0x526   :  { %v1825_v36 = vpop.eup %1824 }
 0x527   :  { %v1304_v18 = vmul.f32 %v1825_v36, %v1303_v12 }
 0x529   :  { %v1306_v40 = vadd.f32 %v1305_v49, %v1304_v18 }
 0x52b   :  { %v1315_v19 = vsel %vm1314_vm7, %v1306_v40, 0.0  ;;  %v2413_v62 = vsel %vm1314_vm7, %v1306_v40, %v2401_v21 }
 0x52c   :  { %1317 = vst [vmem:[#allocation10 + $0x30] sm:$0xff] %v1315_v19  ;;  %v1328_v1 = vpack.c.bf16 %v2413_v62, %v2413_v62 }
 0x52e   :  { %1337 = vmatmul.bf16.vlgmr.msra.gmra.mxu3 %v1328_v1  ;;  %1350 = vmatmul.bf16.vlgmr.msra.gmra.mxu0 %v1328_v1 }
 0x52f   :  { %1363 = vmatmul.bf16.vlgmr.msra.gmra.mxu1 %v1328_v1 }
 0x5ab   :  { %v1351_v59 = vpop.f32.mrf.mxu0 }
 0x5ac   :  { %v1352_v8 = vadd.f32 %v1351_v59, %v2197_v50  ;;  %v1364_v17 = vpop.f32.mrf.mxu1 }
 0x5ad   :  { %v1365_v29 = vadd.f32 %v1364_v17, %v2224_v41 }
 0x5ae   :  { %v1388_v35 = vadd.f32 %v1352_v8, %v1326_v15 }
 0x5b0   :  { %v1678_v44 = vmul.f32 -1.442695, %v1388_v35 }
 0x5b1   :  { %v1338_v21 = vpop.f32.mrf.mxu3 }
 0x5b2   :  { %1826 = vpow2.f32 %v1678_v44  ;;  %v1339_v57 = vadd.f32 %v1338_v21, %v2168_v53 }
 0x5b3   :  { %v1353_v25 = vpop.f32.mrf.mxu0 }
 0x5b4   :  { %v1368_v24 = vadd.f32 %v1339_v57, %v1325_v26  ;;  %v1366_v37 = vpop.f32.mrf.mxu1 }
 0x5b6   :  { %v1677_v48 = vmul.f32 -1.442695, %v1368_v24 }
 0x5b8   :  { %v1827_v58 = vpop.eup %1826  ;;  %1828 = vpow2.f32 %v1677_v48 }
 0x5b9   :  { %v1392_v4 = vadd.f32 1.0, %v1827_v58  ;;  %v1340_v60 = vpop.f32.mrf.mxu3 }
 0x5bb   :  { %1830 = vrcp.f32 %v1392_v4  ;;  %v1404_v11 = vand.u32 2147483648, %v1392_v4  ;;  %vm1398_vm13 = vweird.f32 %v1392_v4  ;;  %v1402_v45 = vand.u32 2147483647, %v1392_v4 }
 0x5bd   :  { %v1405_v5 = vor.u32 1.1754944e-38, %v1404_v11  ;;  %vm1403_vm15 = vcmp.eq.f32.partialorder %v1402_v45, 8.507059e+37 }
 0x5be   :  { %v1829_v50 = vpop.eup %1828 }
 0x5bf   :  { %v1372_v7 = vadd.f32 1.0, %v1829_v50 }
 0x5c1   :  { %1832 = vrcp.f32 %v1372_v7  ;;  %v1831_v14 = vpop.eup %1830  ;;  %v1384_v53 = vand.u32 2147483648, %v1372_v7  ;;  %v1382_v38 = vand.u32 2147483647, %v1372_v7  ;;  %vm1378_vm9 = vweird.f32 %v1372_v7 }
 0x5c2   :  { %v1394_v27 = vmul.f32 %v1831_v14, %v1392_v4  ;;  %vm1399_vm12 = vweird.f32 %v1831_v14 }
 0x5c3   :  { %v1385_v31 = vor.u32 1.1754944e-38, %v1384_v53  ;;  %vm1383_vm11 = vcmp.eq.f32.partialorder %v1382_v38, 8.507059e+37  ;;  %vm1400_vm14 = vmor %vm1398_vm13, %vm1399_vm12 }
 0x5c4   :  { %v1395_v46 = vsub.f32 1.0, %v1394_v27 }
 0x5c6   :  { %v1396_v2 = vmul.f32 %v1831_v14, %v1395_v46 }
 0x5c7   :  { %v1833_v34 = vpop.eup %1832 }
 0x5c8   :  { %v1374_v32 = vmul.f32 %v1833_v34, %v1372_v7  ;;  %vm1379_vm8 = vweird.f32 %v1833_v34  ;;  %v1397_v39 = vadd.f32 %v1831_v14, %v1396_v2 }
 0x5c9   :  { %vm1380_vm10 = vmor %vm1378_vm9, %vm1379_vm8 }
 0x5ca   :  { %v1375_v56 = vsub.f32 1.0, %v1374_v32  ;;  %v1401_v3 = vsel %vm1400_vm14, %v1831_v14, %v1397_v39 }
 0x5cb   :  { %v1406_v54 = vsel %vm1403_vm15, %v1405_v5, %v1401_v3 }
 0x5cc   :  { %v1376_v22 = vmul.f32 %v1833_v34, %v1375_v56  ;;  %v1411_v0 = vsub.f32 1.0, %v1406_v54  ;;  %v1413_v33 = vmul.f32 %v1406_v54, %v2413_v62 }
 0x5ce   :  { %v1377_v20 = vadd.f32 %v1833_v34, %v1376_v22 }
 0x5d0   :  { %v1381_v30 = vsel %vm1380_vm10, %v1833_v34, %v1377_v20 }
 0x5d1   :  { %v1386_v6 = vsel %vm1383_vm11, %v1385_v31, %v1381_v30 }
 0x5d2   :  { %v1408_v61 = vmul.f32 %v1386_v6, %v1365_v29 }
 0x5d4   :  { %v1409_v28 = vadd.f32 %v1408_v61, %v1327_v10 }
 0x5d6   :  { %1834 = vtanh.f32 %v1409_v28 }
 0x5dc   :  { %v1835_v41 = vpop.eup %1834 }
 0x5dd   :  { %v1412_v23 = vmul.f32 %v1835_v41, %v1411_v0 }
 0x5df   :  { %v1414_v63 = vadd.f32 %v1413_v33, %v1412_v23 }
 0x5e1   :  { %v1423_v9 = vsel %vm1422_vm0, %v1414_v63, 0.0 }
 0x5e2   :  { %1425 = vst [vmem:[#allocation10 + $0x38] sm:$0xff] %v1423_v9 }
 0x5e3   :  { %1440 = dma.vmem_to_hbm [thread:$0]  %s1433_s5, 1024, %s1435_s20, [#allocation6], %s1948_s21, %s1948_s21, %s1949_s22  }
 0x5e4   :  { %1936 = dma.done.wait [#allocation6], 1024  }
 0x5e5   :  { %1937 = vsyncadd [#allocation6], 4294966272 }
 0x5e6   :  { %1445 = vsyncpa [#allocation5], 1 }
 0x5e7   :  { %1446 = vsyncpa [#allocation8], 1 }
 0x5e8   :  { %1447 = vsyncpa [#allocation6], 1 }

</bundles_post_ra>
